<compile_context>
chip_gen: v7x
topology: tpu7x:2x2x1
jax: 0.10.0
libtpu: 0.0.40
codegen_flags: <defaults>
</compile_context>

<pallas_src>
import functools

import jax
import jax.numpy as jnp
from jax import lax
from jax.experimental import pallas as pl
from jax.experimental.pallas import tpu as pltpu


# ---------------------------------------------------------------------------
# MXU helpers: bf16 operands (cast by the caller, once), f32 accumulation.
# ---------------------------------------------------------------------------
def _mm(a, b):
    """a @ b (contract a-dim 1 with b-dim 0), f32 accumulation."""
    return lax.dot_general(a, b, dimension_numbers=(((1,), (0,)), ((), ())),
                           preferred_element_type=jnp.float32)


def _mm_nt(a, b):
    """a @ b.T without materializing a transpose (contract dim 1 of both)."""
    return lax.dot_general(a, b, dimension_numbers=(((1,), (1,)), ((), ())),
                           preferred_element_type=jnp.float32)


# ---------------------------------------------------------------------------
# Fused kernel: one block of `Bblk` batch rows per grid step.
# ---------------------------------------------------------------------------
def pool_attention_kernel(drug_ref, prot_ref, vec_ref, w_ref, o_ref,
                          *, num_heads, eps, n_feat):
    F = n_feat
    H = num_heads
    dh = F // H
    Bblk = drug_ref.shape[0]
    f32, bf16 = jnp.float32, jnp.bfloat16

    # ---- unpack the two parameter slabs (static slices) ---------------------
    vec = vec_ref[...]                                      # (3, 4F) f32
    dn_g, dn_b = vec[0:1, 0:F],         vec[0:1, F:2 * F]
    pn_g, pn_b = vec[0:1, 2 * F:3 * F], vec[0:1, 3 * F:4 * F]
    bqkv = vec[1:2, 0:3 * F]                                # scale folded into bq part
    bo   = vec[1:2, 3 * F:4 * F]
    b1   = vec[2:3, 0:2 * F]
    b2   = vec[2:3, 2 * F:3 * F]
    b3   = vec[2:3, 3 * F:3 * F + 2]

    wqkv = w_ref[0:F, :]                                    # (F, 3F) bf16
    wo   = w_ref[F:2 * F, 0:F]                              # (F, F)
    w1a  = w_ref[2 * F:3 * F, 0:2 * F]                      # (F, 2F)  W1 rows for drug
    w1b  = w_ref[3 * F:4 * F, 0:2 * F]                      # (F, 2F)  W1 rows for prot
    w2   = w_ref[4 * F:6 * F, 0:F]                          # (2F, F)
    w3   = w_ref[6 * F:7 * F, 0:2]                          # (F, 2)

    def layer_norm(x, g, b):
        x = x.astype(f32)
        mean = jnp.mean(x, axis=-1, keepdims=True)
        var = jnp.mean((x - mean) ** 2, axis=-1, keepdims=True)   # biased (PyTorch)
        return (x - mean) * lax.rsqrt(var + eps) * g + b

    def project_qkv(xn):
        """(L, F) f32 normalized -> (L, 3F) bf16.  Scale already folded in."""
        return (_mm(xn.astype(bf16), wqkv) + bqkv).astype(bf16)

    def attend_pool(q_n, q_qkv, kv_qkv):
        """max_seq((q_n + MHA(q, kv, kv)) / 2) for one batch row -> (1, F)."""
        heads = []
        for h in range(H):                                  # static, fully unrolled
            Qh = q_qkv[:, h * dh:(h + 1) * dh]                      # (Lq, dh), pre-scaled
            Kh = kv_qkv[:, F + h * dh:F + (h + 1) * dh]             # (Lk, dh)
            Vh = kv_qkv[:, 2 * F + h * dh:2 * F + (h + 1) * dh]     # (Lk, dh)
            S = _mm_nt(Qh, Kh)                                      # (Lq, Lk) f32
            S = S - jnp.max(S, axis=-1, keepdims=True)
            P = jnp.exp(S)
            P = P * pl.reciprocal(jnp.sum(P, axis=-1, keepdims=True), approx=True)
            heads.append(_mm(P.astype(bf16), Vh))                   # (Lq, dh) f32
        O = jnp.concatenate(heads, axis=-1).astype(bf16)            # (Lq, F)
        attn = _mm(O, wo) + bo                                      # single Wo matmul
        resid = (q_n + attn) * 0.5
        return jnp.max(resid, axis=0, keepdims=True)                # (1, F)

    drug_pools, prot_pools = [], []
    for b in range(Bblk):                                   # static, fully unrolled
        drug_n = layer_norm(drug_ref[b], dn_g, dn_b)        # (Ld, F) f32
        prot_n = layer_norm(prot_ref[b], pn_g, pn_b)        # (Lp, F) f32
        drug_qkv = project_qkv(drug_n)                      # shared by both directions
        prot_qkv = project_qkv(prot_n)
        drug_pools.append(attend_pool(drug_n, drug_qkv, prot_qkv))
        prot_pools.append(attend_pool(prot_n, prot_qkv, drug_qkv))
    drug_pool = jnp.concatenate(drug_pools, axis=0).astype(bf16)    # (Bblk, F)
    prot_pool = jnp.concatenate(prot_pools, axis=0).astype(bf16)    # (Bblk, F)

    # MLP head, batched over the block.  Split-row W1 avoids a lane concat of
    # the fused (Bblk, 2F) vector.
    # TODO(synk): Dropout layers are treated as inference-mode identities.
    h1 = jnp.maximum(_mm(drug_pool, w1a) + _mm(prot_pool, w1b) + b1, 0.0).astype(bf16)
    h2 = jnp.maximum(_mm(h1, w2) + b2, 0.0).astype(bf16)
    out = _mm(h2, w3) + b3                                          # (Bblk, 2) f32
    o_ref[...] = out.astype(o_ref.dtype)


# ---------------------------------------------------------------------------
# One-time parameter packing (model-load time, NOT on the per-call path).
# ---------------------------------------------------------------------------
def prepare_params(params, num_heads):
    """Pack 20 tensors into 2 slabs.

    Vector slab (f32, (3, 4F)):
      row 0: [dn_g | dn_b | pn_g | pn_b]
      row 1: [bq * 1/sqrt(dh) | bk | bv | bo]
      row 2: [b1 (2F) | b2 (F) | b3 (2) | 0-pad]
    Weight slab (bf16, (7F, 3F), [in, out] orientation, zero-padded lanes):
      rows [0 , F ): Wqkv = [Wq^T * 1/sqrt(dh) | Wk^T | Wv^T]
      rows [F , 2F): Wo^T          rows [2F, 4F): W1^T
      rows [4F, 6F): W2^T          rows [6F, 7F): W3^T
    """
    Fd = params["wq"].shape[0]
    dh = Fd // num_heads
    scale = 1.0 / float(dh) ** 0.5
    f32 = jnp.float32

    vec = jnp.zeros((3, 4 * Fd), f32)
    vec = vec.at[0, 0:Fd].set(params["dn_g"])
    vec = vec.at[0, Fd:2 * Fd].set(params["dn_b"])
    vec = vec.at[0, 2 * Fd:3 * Fd].set(params["pn_g"])
    vec = vec.at[0, 3 * Fd:4 * Fd].set(params["pn_b"])
    vec = vec.at[1, 0:Fd].set(params["bq"] * scale)
    vec = vec.at[1, Fd:2 * Fd].set(params["bk"])
    vec = vec.at[1, 2 * Fd:3 * Fd].set(params["bv"])
    vec = vec.at[1, 3 * Fd:4 * Fd].set(params["bo"])
    vec = vec.at[2, 0:2 * Fd].set(params["b1"])
    vec = vec.at[2, 2 * Fd:3 * Fd].set(params["b2"])
    vec = vec.at[2, 3 * Fd:3 * Fd + 2].set(params["b3"])

    w = jnp.zeros((7 * Fd, 3 * Fd), f32)
    wqkv = jnp.concatenate(
        [params["wq"].T * scale, params["wk"].T, params["wv"].T], axis=1)
    w = w.at[0:Fd, :].set(wqkv)
    w = w.at[Fd:2 * Fd, 0:Fd].set(params["wo"].T)
    w = w.at[2 * Fd:4 * Fd, 0:2 * Fd].set(params["w1"].T)
    w = w.at[4 * Fd:6 * Fd, 0:Fd].set(params["w2"].T)
    w = w.at[6 * Fd:7 * Fd, 0:2].set(params["w3"].T)

    return {"vec": vec, "w": w.astype(jnp.bfloat16)}


def _default_batch_block(batch):
    """v7x has 2 TensorCores -> one batch row per (parallel) grid step.
    Single-TC generations (v5e/v6e) take the whole batch in ONE grid step."""
    try:
        kind = jax.devices()[0].device_kind.lower()
    except Exception:
        kind = ""
    if "v7" in kind and batch > 1:
        return 1
    return batch


# ---------------------------------------------------------------------------
# Wrapper: one pallas_call, 4 operands, for the whole forward pass.
# ---------------------------------------------------------------------------
def pool_attention_forward(drug, prot, prepped, num_heads, eps=1e-5,
                           batch_block=None):
    B, Ld, Fd = drug.shape
    _, Lp, _ = prot.shape
    if batch_block is None:
        batch_block = _default_batch_block(B)
    assert B % batch_block == 0

    vec, w = prepped["vec"], prepped["w"]
    kernel = functools.partial(pool_attention_kernel,
                               num_heads=num_heads, eps=eps, n_feat=Fd)
    const2d = lambda arr: pl.BlockSpec(arr.shape, lambda i: (0, 0))

    return pl.pallas_call(
        kernel,
        out_shape=jax.ShapeDtypeStruct((B, 2), jnp.float32),
        grid=(B // batch_block,),
        in_specs=[
            pl.BlockSpec((batch_block, Ld, Fd), lambda i: (i, 0, 0)),
            pl.BlockSpec((batch_block, Lp, Fd), lambda i: (i, 0, 0)),
            const2d(vec),
            const2d(w),
        ],
        out_specs=pl.BlockSpec((batch_block, 2), lambda i: (i, 0)),
        compiler_params=pltpu.CompilerParams(
            dimension_semantics=("parallel",)),
    )(drug, prot, vec, w)


# ---------------------------------------------------------------------------
# Pure-JAX reference (mirrors the PyTorch module) for a sanity check.
# ---------------------------------------------------------------------------
def reference_forward(drug, prot, params, num_heads, eps=1e-5):
    def ln(x, g, b):
        mean = jnp.mean(x, axis=-1, keepdims=True)
        var = jnp.mean((x - mean) ** 2, axis=-1, keepdims=True)
        return (x - mean) / jnp.sqrt(var + eps) * g + b

    def mha(q, kv):
        B, Lq, F = q.shape
        Lk = kv.shape[1]
        dh = F // num_heads
        Q = q @ params["wq"].T + params["bq"]
        K = kv @ params["wk"].T + params["bk"]
        V = kv @ params["wv"].T + params["bv"]
        Q = Q.reshape(B, Lq, num_heads, dh).transpose(0, 2, 1, 3)
        K = K.reshape(B, Lk, num_heads, dh).transpose(0, 2, 1, 3)
        V = V.reshape(B, Lk, num_heads, dh).transpose(0, 2, 1, 3)
        S = jnp.einsum("bhqd,bhkd->bhqk", Q, K) / jnp.sqrt(float(dh))
        P = jax.nn.softmax(S, axis=-1)
        O = jnp.einsum("bhqk,bhkd->bhqd", P, V)
        O = O.transpose(0, 2, 1, 3).reshape(B, Lq, F)
        return O @ params["wo"].T + params["bo"]

    drug_n = ln(drug, params["dn_g"], params["dn_b"])
    prot_n = ln(prot, params["pn_g"], params["pn_b"])
    drug_pool = jnp.max((drug_n + mha(drug_n, prot_n)) / 2, axis=1)
    prot_pool = jnp.max((prot_n + mha(prot_n, drug_n)) / 2, axis=1)
    fused = jnp.concatenate([drug_pool, prot_pool], axis=-1)
    h1 = jax.nn.relu(fused @ params["w1"].T + params["b1"])
    h2 = jax.nn.relu(h1 @ params["w2"].T + params["b2"])
    return h2 @ params["w3"].T + params["b3"]


def init_params(key, n_features):
    Fd = n_features
    ks = jax.random.split(key, 12)
    s = 0.1
    return {
        "dn_g": jnp.ones((Fd,), jnp.float32),
        "dn_b": jnp.zeros((Fd,), jnp.float32),
        "pn_g": jnp.ones((Fd,), jnp.float32),
        "pn_b": jnp.zeros((Fd,), jnp.float32),
        "wq": s * jax.random.normal(ks[0], (Fd, Fd), jnp.float32),
        "wk": s * jax.random.normal(ks[1], (Fd, Fd), jnp.float32),
        "wv": s * jax.random.normal(ks[2], (Fd, Fd), jnp.float32),
        "wo": s * jax.random.normal(ks[3], (Fd, Fd), jnp.float32),
        "bq": s * jax.random.normal(ks[4], (Fd,), jnp.float32),
        "bk": s * jax.random.normal(ks[5], (Fd,), jnp.float32),
        "bv": s * jax.random.normal(ks[6], (Fd,), jnp.float32),
        "bo": s * jax.random.normal(ks[7], (Fd,), jnp.float32),
        "w1": s * jax.random.normal(ks[8], (2 * Fd, 2 * Fd), jnp.float32),
        "b1": jnp.zeros((2 * Fd,), jnp.float32),
        "w2": s * jax.random.normal(ks[9], (Fd, 2 * Fd), jnp.float32),
        "b2": jnp.zeros((Fd,), jnp.float32),
        "w3": s * jax.random.normal(ks[10], (2, Fd), jnp.float32),
        "b3": jnp.zeros((2,), jnp.float32),
    }


if __name__ == "__main__":
    B, Ld, Lp, Fd, H = 2, 8, 12, 32, 4
    key = jax.random.PRNGKey(0)
    k_drug, k_prot, k_param = jax.random.split(key, 3)

    drug = jax.random.normal(k_drug, (B, Ld, Fd), jnp.float32)
    prot = jax.random.normal(k_prot, (B, Lp, Fd), jnp.float32)
    params = init_params(k_param, Fd)

    # One-time parameter packing (model-load time), outside the hot path.
    prepped = prepare_params(params, num_heads=H)

    scores = pool_attention_forward(drug, prot, prepped, num_heads=H)
    scores = jax.block_until_ready(scores)
    assert scores.shape == (B, 2)

    ref = reference_forward(drug, prot, params, H)
    err = float(jnp.max(jnp.abs(scores - ref)))
    assert err < 5e-2, f"kernel/reference mismatch: max abs err = {err}"
    print("KERNEL_OK")
</pallas_src>

<mosaic_0001>
module attributes {stable_mosaic.version = 11 : i64} {
  func.func @pool_attention_kernel(%arg0: i32, %arg1: memref<2x8x32xf32, #tpu.memory_space<vmem>>, %arg2: memref<2x12x32xf32, #tpu.memory_space<vmem>>, %arg3: memref<3x128xf32, #tpu.memory_space<vmem>>, %arg4: memref<224x96xbf16, #tpu.memory_space<vmem>>, %arg5: memref<2x2xf32, #tpu.memory_space<vmem>>) attributes {dimension_semantics = [#tpu.dimension_semantics<parallel>], iteration_bounds = array<i64: 1>, scalar_prefetch = 0 : i64, scratch_operands = 0 : i64, tpu.core_type = #tpu.core_type<tc>, window_params = [{transform_indices = @transform_0, window_bounds = array<i64: 2, 8, 32>}, {transform_indices = @transform_1, window_bounds = array<i64: 2, 12, 32>}, {pipeline_mode = #tpu.pipeline_mode<synchronous>, transform_indices = @transform_2, window_bounds = array<i64: 3, 128>}, {pipeline_mode = #tpu.pipeline_mode<synchronous>, transform_indices = @transform_3, window_bounds = array<i64: 224, 96>}, {transform_indices = @transform_4, window_bounds = array<i64: 2, 2>}]} {
    %c0 = arith.constant 0 : index
    %c0_0 = arith.constant 0 : index
    %0 = vector.load %arg3[%c0, %c0_0] : memref<3x128xf32, #tpu.memory_space<vmem>>, vector<3x128xf32>
    %1 = vector.extract_strided_slice %0 {offsets = [0, 0], sizes = [1, 32], strides = [1, 1]} : vector<3x128xf32> to vector<1x32xf32>
    %2 = vector.extract_strided_slice %0 {offsets = [0, 32], sizes = [1, 32], strides = [1, 1]} : vector<3x128xf32> to vector<1x32xf32>
    %3 = vector.extract_strided_slice %0 {offsets = [0, 64], sizes = [1, 32], strides = [1, 1]} : vector<3x128xf32> to vector<1x32xf32>
    %4 = vector.extract_strided_slice %0 {offsets = [0, 96], sizes = [1, 32], strides = [1, 1]} : vector<3x128xf32> to vector<1x32xf32>
    %5 = vector.extract_strided_slice %0 {offsets = [1, 0], sizes = [1, 96], strides = [1, 1]} : vector<3x128xf32> to vector<1x96xf32>
    %6 = vector.extract_strided_slice %0 {offsets = [1, 96], sizes = [1, 32], strides = [1, 1]} : vector<3x128xf32> to vector<1x32xf32>
    %7 = vector.extract_strided_slice %0 {offsets = [2, 0], sizes = [1, 64], strides = [1, 1]} : vector<3x128xf32> to vector<1x64xf32>
    %8 = vector.extract_strided_slice %0 {offsets = [2, 64], sizes = [1, 32], strides = [1, 1]} : vector<3x128xf32> to vector<1x32xf32>
    %9 = vector.extract_strided_slice %0 {offsets = [2, 96], sizes = [1, 2], strides = [1, 1]} : vector<3x128xf32> to vector<1x2xf32>
    %c0_1 = arith.constant 0 : index
    %c0_2 = arith.constant 0 : index
    %10 = vector.load %arg4[%c0_1, %c0_2] : memref<224x96xbf16, #tpu.memory_space<vmem>>, vector<32x96xbf16>
    %c32 = arith.constant 32 : index
    %c0_3 = arith.constant 0 : index
    %11 = vector.load %arg4[%c32, %c0_3] : memref<224x96xbf16, #tpu.memory_space<vmem>>, vector<32x32xbf16>
    %c64 = arith.constant 64 : index
    %c0_4 = arith.constant 0 : index
    %12 = vector.load %arg4[%c64, %c0_4] : memref<224x96xbf16, #tpu.memory_space<vmem>>, vector<32x64xbf16>
    %c96 = arith.constant 96 : index
    %c0_5 = arith.constant 0 : index
    %13 = vector.load %arg4[%c96, %c0_5] : memref<224x96xbf16, #tpu.memory_space<vmem>>, vector<32x64xbf16>
    %c128 = arith.constant 128 : index
    %c0_6 = arith.constant 0 : index
    %14 = vector.load %arg4[%c128, %c0_6] : memref<224x96xbf16, #tpu.memory_space<vmem>>, vector<64x32xbf16>
    %c192 = arith.constant 192 : index
    %c0_7 = arith.constant 0 : index
    %15 = vector.load %arg4[%c192, %c0_7] : memref<224x96xbf16, #tpu.memory_space<vmem>>, vector<32x2xbf16>
    %c0_8 = arith.constant 0 : index
    %c0_9 = arith.constant 0 : index
    %c0_10 = arith.constant 0 : index
    %16 = vector.load %arg1[%c0_8, %c0_9, %c0_10] : memref<2x8x32xf32, #tpu.memory_space<vmem>>, vector<1x8x32xf32>
    %17 = vector.shape_cast %16 : vector<1x8x32xf32> to vector<8x32xf32>
    %cst = arith.constant dense<0.000000e+00> : vector<8xf32>
    %18 = vector.multi_reduction <add>, %17, %cst [1] : vector<8x32xf32> to vector<8xf32>
    %19 = vector.shape_cast %18 : vector<8xf32> to vector<8x1xf32>
    %cst_11 = arith.constant 3.200000e+01 : f32
    %20 = vector.broadcast %cst_11 : f32 to vector<8x1xf32>
    %21 = arith.divf %19, %20 : vector<8x1xf32>
    %22 = vector.broadcast %21 : vector<8x1xf32> to vector<8x32xf32>
    %23 = arith.subf %17, %22 : vector<8x32xf32>
    %24 = arith.mulf %23, %23 : vector<8x32xf32>
    %cst_12 = arith.constant dense<0.000000e+00> : vector<8xf32>
    %25 = vector.multi_reduction <add>, %24, %cst_12 [1] : vector<8x32xf32> to vector<8xf32>
    %26 = vector.shape_cast %25 : vector<8xf32> to vector<8x1xf32>
    %cst_13 = arith.constant 3.200000e+01 : f32
    %27 = vector.broadcast %cst_13 : f32 to vector<8x1xf32>
    %28 = arith.divf %26, %27 : vector<8x1xf32>
    %29 = vector.broadcast %21 : vector<8x1xf32> to vector<8x32xf32>
    %30 = arith.subf %17, %29 : vector<8x32xf32>
    %cst_14 = arith.constant 9.99999974E-6 : f32
    %31 = vector.broadcast %cst_14 : f32 to vector<8x1xf32>
    %32 = arith.addf %28, %31 : vector<8x1xf32>
    %33 = math.rsqrt %32 : vector<8x1xf32>
    %34 = vector.broadcast %33 : vector<8x1xf32> to vector<8x32xf32>
    %35 = arith.mulf %30, %34 : vector<8x32xf32>
    %36 = vector.broadcast %1 : vector<1x32xf32> to vector<8x32xf32>
    %37 = arith.mulf %35, %36 : vector<8x32xf32>
    %38 = vector.broadcast %2 : vector<1x32xf32> to vector<8x32xf32>
    %39 = arith.addf %37, %38 : vector<8x32xf32>
    %c0_15 = arith.constant 0 : index
    %c0_16 = arith.constant 0 : index
    %c0_17 = arith.constant 0 : index
    %40 = vector.load %arg2[%c0_15, %c0_16, %c0_17] : memref<2x12x32xf32, #tpu.memory_space<vmem>>, vector<1x12x32xf32>
    %41 = vector.shape_cast %40 : vector<1x12x32xf32> to vector<12x32xf32>
    %cst_18 = arith.constant dense<0.000000e+00> : vector<12xf32>
    %42 = vector.multi_reduction <add>, %41, %cst_18 [1] : vector<12x32xf32> to vector<12xf32>
    %43 = vector.shape_cast %42 : vector<12xf32> to vector<12x1xf32>
    %cst_19 = arith.constant 3.200000e+01 : f32
    %44 = vector.broadcast %cst_19 : f32 to vector<12x1xf32>
    %45 = arith.divf %43, %44 : vector<12x1xf32>
    %46 = vector.broadcast %45 : vector<12x1xf32> to vector<12x32xf32>
    %47 = arith.subf %41, %46 : vector<12x32xf32>
    %48 = arith.mulf %47, %47 : vector<12x32xf32>
    %cst_20 = arith.constant dense<0.000000e+00> : vector<12xf32>
    %49 = vector.multi_reduction <add>, %48, %cst_20 [1] : vector<12x32xf32> to vector<12xf32>
    %50 = vector.shape_cast %49 : vector<12xf32> to vector<12x1xf32>
    %cst_21 = arith.constant 3.200000e+01 : f32
    %51 = vector.broadcast %cst_21 : f32 to vector<12x1xf32>
    %52 = arith.divf %50, %51 : vector<12x1xf32>
    %53 = vector.broadcast %45 : vector<12x1xf32> to vector<12x32xf32>
    %54 = arith.subf %41, %53 : vector<12x32xf32>
    %cst_22 = arith.constant 9.99999974E-6 : f32
    %55 = vector.broadcast %cst_22 : f32 to vector<12x1xf32>
    %56 = arith.addf %52, %55 : vector<12x1xf32>
    %57 = math.rsqrt %56 : vector<12x1xf32>
    %58 = vector.broadcast %57 : vector<12x1xf32> to vector<12x32xf32>
    %59 = arith.mulf %54, %58 : vector<12x32xf32>
    %60 = vector.broadcast %3 : vector<1x32xf32> to vector<12x32xf32>
    %61 = arith.mulf %59, %60 : vector<12x32xf32>
    %62 = vector.broadcast %4 : vector<1x32xf32> to vector<12x32xf32>
    %63 = arith.addf %61, %62 : vector<12x32xf32>
    %64 = arith.truncf %39 : vector<8x32xf32> to vector<8x32xbf16>
    %cst_23 = arith.constant dense<0.000000e+00> : vector<8x96xf32>
    %65 = tpu.matmul %64, %10, %cst_23 {dimension_numbers = #tpu.dot_dimension_numbers<[1], [0], [0], [1], [0, 0, 1, 1], [], []>} : vector<8x32xbf16>, vector<32x96xbf16>, vector<8x96xf32> -> vector<8x96xf32>
    %66 = vector.broadcast %5 : vector<1x96xf32> to vector<8x96xf32>
    %67 = arith.addf %65, %66 : vector<8x96xf32>
    %68 = arith.truncf %67 : vector<8x96xf32> to vector<8x96xbf16>
    %69 = arith.truncf %63 : vector<12x32xf32> to vector<12x32xbf16>
    %cst_24 = arith.constant dense<0.000000e+00> : vector<12x96xf32>
    %70 = tpu.matmul %69, %10, %cst_24 {dimension_numbers = #tpu.dot_dimension_numbers<[1], [0], [0], [1], [0, 0, 1, 1], [], []>} : vector<12x32xbf16>, vector<32x96xbf16>, vector<12x96xf32> -> vector<12x96xf32>
    %71 = vector.broadcast %5 : vector<1x96xf32> to vector<12x96xf32>
    %72 = arith.addf %70, %71 : vector<12x96xf32>
    %73 = arith.truncf %72 : vector<12x96xf32> to vector<12x96xbf16>
    %74 = vector.extract_strided_slice %68 {offsets = [0, 0], sizes = [8, 8], strides = [1, 1]} : vector<8x96xbf16> to vector<8x8xbf16>
    %75 = vector.extract_strided_slice %73 {offsets = [0, 32], sizes = [12, 8], strides = [1, 1]} : vector<12x96xbf16> to vector<12x8xbf16>
    %76 = vector.extract_strided_slice %73 {offsets = [0, 64], sizes = [12, 8], strides = [1, 1]} : vector<12x96xbf16> to vector<12x8xbf16>
    %cst_25 = arith.constant dense<0.000000e+00> : vector<8x12xf32>
    %77 = tpu.matmul %74, %75, %cst_25 {dimension_numbers = #tpu.dot_dimension_numbers<[1], [1], [0], [0], [0, 0, 1, 0], [], []>} : vector<8x8xbf16>, vector<12x8xbf16>, vector<8x12xf32> -> vector<8x12xf32>
    %cst_26 = arith.constant dense<0xFF800000> : vector<8xf32>
    %78 = vector.multi_reduction <maximumf>, %77, %cst_26 [1] : vector<8x12xf32> to vector<8xf32>
    %79 = vector.shape_cast %78 : vector<8xf32> to vector<8x1xf32>
    %80 = vector.broadcast %79 : vector<8x1xf32> to vector<8x12xf32>
    %81 = arith.subf %77, %80 : vector<8x12xf32>
    %82 = math.exp %81 : vector<8x12xf32>
    %cst_27 = arith.constant dense<0.000000e+00> : vector<8xf32>
    %83 = vector.multi_reduction <add>, %82, %cst_27 [1] : vector<8x12xf32> to vector<8xf32>
    %84 = vector.shape_cast %83 : vector<8xf32> to vector<8x1xf32>
    %85 = tpu.reciprocal %84 {approx = true} : vector<8x1xf32> -> vector<8x1xf32>
    %86 = vector.broadcast %85 : vector<8x1xf32> to vector<8x12xf32>
    %87 = arith.mulf %82, %86 : vector<8x12xf32>
    %88 = arith.truncf %87 : vector<8x12xf32> to vector<8x12xbf16>
    %cst_28 = arith.constant dense<0.000000e+00> : vector<8x8xf32>
    %89 = tpu.matmul %88, %76, %cst_28 {dimension_numbers = #tpu.dot_dimension_numbers<[1], [0], [0], [1], [0, 0, 1, 1], [], []>} : vector<8x12xbf16>, vector<12x8xbf16>, vector<8x8xf32> -> vector<8x8xf32>
    %90 = vector.extract_strided_slice %68 {offsets = [0, 8], sizes = [8, 8], strides = [1, 1]} : vector<8x96xbf16> to vector<8x8xbf16>
    %91 = vector.extract_strided_slice %73 {offsets = [0, 40], sizes = [12, 8], strides = [1, 1]} : vector<12x96xbf16> to vector<12x8xbf16>
    %92 = vector.extract_strided_slice %73 {offsets = [0, 72], sizes = [12, 8], strides = [1, 1]} : vector<12x96xbf16> to vector<12x8xbf16>
    %cst_29 = arith.constant dense<0.000000e+00> : vector<8x12xf32>
    %93 = tpu.matmul %90, %91, %cst_29 {dimension_numbers = #tpu.dot_dimension_numbers<[1], [1], [0], [0], [0, 0, 1, 0], [], []>} : vector<8x8xbf16>, vector<12x8xbf16>, vector<8x12xf32> -> vector<8x12xf32>
    %cst_30 = arith.constant dense<0xFF800000> : vector<8xf32>
    %94 = vector.multi_reduction <maximumf>, %93, %cst_30 [1] : vector<8x12xf32> to vector<8xf32>
    %95 = vector.shape_cast %94 : vector<8xf32> to vector<8x1xf32>
    %96 = vector.broadcast %95 : vector<8x1xf32> to vector<8x12xf32>
    %97 = arith.subf %93, %96 : vector<8x12xf32>
    %98 = math.exp %97 : vector<8x12xf32>
    %cst_31 = arith.constant dense<0.000000e+00> : vector<8xf32>
    %99 = vector.multi_reduction <add>, %98, %cst_31 [1] : vector<8x12xf32> to vector<8xf32>
    %100 = vector.shape_cast %99 : vector<8xf32> to vector<8x1xf32>
    %101 = tpu.reciprocal %100 {approx = true} : vector<8x1xf32> -> vector<8x1xf32>
    %102 = vector.broadcast %101 : vector<8x1xf32> to vector<8x12xf32>
    %103 = arith.mulf %98, %102 : vector<8x12xf32>
    %104 = arith.truncf %103 : vector<8x12xf32> to vector<8x12xbf16>
    %cst_32 = arith.constant dense<0.000000e+00> : vector<8x8xf32>
    %105 = tpu.matmul %104, %92, %cst_32 {dimension_numbers = #tpu.dot_dimension_numbers<[1], [0], [0], [1], [0, 0, 1, 1], [], []>} : vector<8x12xbf16>, vector<12x8xbf16>, vector<8x8xf32> -> vector<8x8xf32>
    %106 = vector.extract_strided_slice %68 {offsets = [0, 16], sizes = [8, 8], strides = [1, 1]} : vector<8x96xbf16> to vector<8x8xbf16>
    %107 = vector.extract_strided_slice %73 {offsets = [0, 48], sizes = [12, 8], strides = [1, 1]} : vector<12x96xbf16> to vector<12x8xbf16>
    %108 = vector.extract_strided_slice %73 {offsets = [0, 80], sizes = [12, 8], strides = [1, 1]} : vector<12x96xbf16> to vector<12x8xbf16>
    %cst_33 = arith.constant dense<0.000000e+00> : vector<8x12xf32>
    %109 = tpu.matmul %106, %107, %cst_33 {dimension_numbers = #tpu.dot_dimension_numbers<[1], [1], [0], [0], [0, 0, 1, 0], [], []>} : vector<8x8xbf16>, vector<12x8xbf16>, vector<8x12xf32> -> vector<8x12xf32>
    %cst_34 = arith.constant dense<0xFF800000> : vector<8xf32>
    %110 = vector.multi_reduction <maximumf>, %109, %cst_34 [1] : vector<8x12xf32> to vector<8xf32>
    %111 = vector.shape_cast %110 : vector<8xf32> to vector<8x1xf32>
    %112 = vector.broadcast %111 : vector<8x1xf32> to vector<8x12xf32>
    %113 = arith.subf %109, %112 : vector<8x12xf32>
    %114 = math.exp %113 : vector<8x12xf32>
    %cst_35 = arith.constant dense<0.000000e+00> : vector<8xf32>
    %115 = vector.multi_reduction <add>, %114, %cst_35 [1] : vector<8x12xf32> to vector<8xf32>
    %116 = vector.shape_cast %115 : vector<8xf32> to vector<8x1xf32>
    %117 = tpu.reciprocal %116 {approx = true} : vector<8x1xf32> -> vector<8x1xf32>
    %118 = vector.broadcast %117 : vector<8x1xf32> to vector<8x12xf32>
    %119 = arith.mulf %114, %118 : vector<8x12xf32>
    %120 = arith.truncf %119 : vector<8x12xf32> to vector<8x12xbf16>
    %cst_36 = arith.constant dense<0.000000e+00> : vector<8x8xf32>
    %121 = tpu.matmul %120, %108, %cst_36 {dimension_numbers = #tpu.dot_dimension_numbers<[1], [0], [0], [1], [0, 0, 1, 1], [], []>} : vector<8x12xbf16>, vector<12x8xbf16>, vector<8x8xf32> -> vector<8x8xf32>
    %122 = vector.extract_strided_slice %68 {offsets = [0, 24], sizes = [8, 8], strides = [1, 1]} : vector<8x96xbf16> to vector<8x8xbf16>
    %123 = vector.extract_strided_slice %73 {offsets = [0, 56], sizes = [12, 8], strides = [1, 1]} : vector<12x96xbf16> to vector<12x8xbf16>
    %124 = vector.extract_strided_slice %73 {offsets = [0, 88], sizes = [12, 8], strides = [1, 1]} : vector<12x96xbf16> to vector<12x8xbf16>
    %cst_37 = arith.constant dense<0.000000e+00> : vector<8x12xf32>
    %125 = tpu.matmul %122, %123, %cst_37 {dimension_numbers = #tpu.dot_dimension_numbers<[1], [1], [0], [0], [0, 0, 1, 0], [], []>} : vector<8x8xbf16>, vector<12x8xbf16>, vector<8x12xf32> -> vector<8x12xf32>
    %cst_38 = arith.constant dense<0xFF800000> : vector<8xf32>
    %126 = vector.multi_reduction <maximumf>, %125, %cst_38 [1] : vector<8x12xf32> to vector<8xf32>
    %127 = vector.shape_cast %126 : vector<8xf32> to vector<8x1xf32>
    %128 = vector.broadcast %127 : vector<8x1xf32> to vector<8x12xf32>
    %129 = arith.subf %125, %128 : vector<8x12xf32>
    %130 = math.exp %129 : vector<8x12xf32>
    %cst_39 = arith.constant dense<0.000000e+00> : vector<8xf32>
    %131 = vector.multi_reduction <add>, %130, %cst_39 [1] : vector<8x12xf32> to vector<8xf32>
    %132 = vector.shape_cast %131 : vector<8xf32> to vector<8x1xf32>
    %133 = tpu.reciprocal %132 {approx = true} : vector<8x1xf32> -> vector<8x1xf32>
    %134 = vector.broadcast %133 : vector<8x1xf32> to vector<8x12xf32>
    %135 = arith.mulf %130, %134 : vector<8x12xf32>
    %136 = arith.truncf %135 : vector<8x12xf32> to vector<8x12xbf16>
    %cst_40 = arith.constant dense<0.000000e+00> : vector<8x8xf32>
    %137 = tpu.matmul %136, %124, %cst_40 {dimension_numbers = #tpu.dot_dimension_numbers<[1], [0], [0], [1], [0, 0, 1, 1], [], []>} : vector<8x12xbf16>, vector<12x8xbf16>, vector<8x8xf32> -> vector<8x8xf32>
    %138 = tpu.concatenate %89, %105, %121, %137 in 1 : vector<8x8xf32>, vector<8x8xf32>, vector<8x8xf32>, vector<8x8xf32> -> vector<8x32xf32>
    %139 = arith.truncf %138 : vector<8x32xf32> to vector<8x32xbf16>
    %cst_41 = arith.constant dense<0.000000e+00> : vector<8x32xf32>
    %140 = tpu.matmul %139, %11, %cst_41 {dimension_numbers = #tpu.dot_dimension_numbers<[1], [0], [0], [1], [0, 0, 1, 1], [], []>} : vector<8x32xbf16>, vector<32x32xbf16>, vector<8x32xf32> -> vector<8x32xf32>
    %141 = vector.broadcast %6 : vector<1x32xf32> to vector<8x32xf32>
    %142 = arith.addf %140, %141 : vector<8x32xf32>
    %143 = arith.addf %39, %142 : vector<8x32xf32>
    %cst_42 = arith.constant 5.000000e-01 : f32
    %144 = vector.broadcast %cst_42 : f32 to vector<8x32xf32>
    %145 = arith.mulf %143, %144 : vector<8x32xf32>
    %cst_43 = arith.constant dense<0xFF800000> : vector<32xf32>
    %146 = vector.multi_reduction <maximumf>, %145, %cst_43 [0] : vector<8x32xf32> to vector<32xf32>
    %147 = vector.shape_cast %146 : vector<32xf32> to vector<1x32xf32>
    %148 = vector.extract_strided_slice %73 {offsets = [0, 0], sizes = [12, 8], strides = [1, 1]} : vector<12x96xbf16> to vector<12x8xbf16>
    %149 = vector.extract_strided_slice %68 {offsets = [0, 32], sizes = [8, 8], strides = [1, 1]} : vector<8x96xbf16> to vector<8x8xbf16>
    %150 = vector.extract_strided_slice %68 {offsets = [0, 64], sizes = [8, 8], strides = [1, 1]} : vector<8x96xbf16> to vector<8x8xbf16>
    %cst_44 = arith.constant dense<0.000000e+00> : vector<12x8xf32>
    %151 = tpu.matmul %148, %149, %cst_44 {dimension_numbers = #tpu.dot_dimension_numbers<[1], [1], [0], [0], [0, 0, 1, 0], [], []>} : vector<12x8xbf16>, vector<8x8xbf16>, vector<12x8xf32> -> vector<12x8xf32>
    %cst_45 = arith.constant dense<0xFF800000> : vector<12xf32>
    %152 = vector.multi_reduction <maximumf>, %151, %cst_45 [1] : vector<12x8xf32> to vector<12xf32>
    %153 = vector.shape_cast %152 : vector<12xf32> to vector<12x1xf32>
    %154 = vector.broadcast %153 : vector<12x1xf32> to vector<12x8xf32>
    %155 = arith.subf %151, %154 : vector<12x8xf32>
    %156 = math.exp %155 : vector<12x8xf32>
    %cst_46 = arith.constant dense<0.000000e+00> : vector<12xf32>
    %157 = vector.multi_reduction <add>, %156, %cst_46 [1] : vector<12x8xf32> to vector<12xf32>
    %158 = vector.shape_cast %157 : vector<12xf32> to vector<12x1xf32>
    %159 = tpu.reciprocal %158 {approx = true} : vector<12x1xf32> -> vector<12x1xf32>
    %160 = vector.broadcast %159 : vector<12x1xf32> to vector<12x8xf32>
    %161 = arith.mulf %156, %160 : vector<12x8xf32>
    %162 = arith.truncf %161 : vector<12x8xf32> to vector<12x8xbf16>
    %cst_47 = arith.constant dense<0.000000e+00> : vector<12x8xf32>
    %163 = tpu.matmul %162, %150, %cst_47 {dimension_numbers = #tpu.dot_dimension_numbers<[1], [0], [0], [1], [0, 0, 1, 1], [], []>} : vector<12x8xbf16>, vector<8x8xbf16>, vector<12x8xf32> -> vector<12x8xf32>
    %164 = vector.extract_strided_slice %73 {offsets = [0, 8], sizes = [12, 8], strides = [1, 1]} : vector<12x96xbf16> to vector<12x8xbf16>
    %165 = vector.extract_strided_slice %68 {offsets = [0, 40], sizes = [8, 8], strides = [1, 1]} : vector<8x96xbf16> to vector<8x8xbf16>
    %166 = vector.extract_strided_slice %68 {offsets = [0, 72], sizes = [8, 8], strides = [1, 1]} : vector<8x96xbf16> to vector<8x8xbf16>
    %cst_48 = arith.constant dense<0.000000e+00> : vector<12x8xf32>
    %167 = tpu.matmul %164, %165, %cst_48 {dimension_numbers = #tpu.dot_dimension_numbers<[1], [1], [0], [0], [0, 0, 1, 0], [], []>} : vector<12x8xbf16>, vector<8x8xbf16>, vector<12x8xf32> -> vector<12x8xf32>
    %cst_49 = arith.constant dense<0xFF800000> : vector<12xf32>
    %168 = vector.multi_reduction <maximumf>, %167, %cst_49 [1] : vector<12x8xf32> to vector<12xf32>
    %169 = vector.shape_cast %168 : vector<12xf32> to vector<12x1xf32>
    %170 = vector.broadcast %169 : vector<12x1xf32> to vector<12x8xf32>
    %171 = arith.subf %167, %170 : vector<12x8xf32>
    %172 = math.exp %171 : vector<12x8xf32>
    %cst_50 = arith.constant dense<0.000000e+00> : vector<12xf32>
    %173 = vector.multi_reduction <add>, %172, %cst_50 [1] : vector<12x8xf32> to vector<12xf32>
    %174 = vector.shape_cast %173 : vector<12xf32> to vector<12x1xf32>
    %175 = tpu.reciprocal %174 {approx = true} : vector<12x1xf32> -> vector<12x1xf32>
    %176 = vector.broadcast %175 : vector<12x1xf32> to vector<12x8xf32>
    %177 = arith.mulf %172, %176 : vector<12x8xf32>
    %178 = arith.truncf %177 : vector<12x8xf32> to vector<12x8xbf16>
    %cst_51 = arith.constant dense<0.000000e+00> : vector<12x8xf32>
    %179 = tpu.matmul %178, %166, %cst_51 {dimension_numbers = #tpu.dot_dimension_numbers<[1], [0], [0], [1], [0, 0, 1, 1], [], []>} : vector<12x8xbf16>, vector<8x8xbf16>, vector<12x8xf32> -> vector<12x8xf32>
    %180 = vector.extract_strided_slice %73 {offsets = [0, 16], sizes = [12, 8], strides = [1, 1]} : vector<12x96xbf16> to vector<12x8xbf16>
    %181 = vector.extract_strided_slice %68 {offsets = [0, 48], sizes = [8, 8], strides = [1, 1]} : vector<8x96xbf16> to vector<8x8xbf16>
    %182 = vector.extract_strided_slice %68 {offsets = [0, 80], sizes = [8, 8], strides = [1, 1]} : vector<8x96xbf16> to vector<8x8xbf16>
    %cst_52 = arith.constant dense<0.000000e+00> : vector<12x8xf32>
    %183 = tpu.matmul %180, %181, %cst_52 {dimension_numbers = #tpu.dot_dimension_numbers<[1], [1], [0], [0], [0, 0, 1, 0], [], []>} : vector<12x8xbf16>, vector<8x8xbf16>, vector<12x8xf32> -> vector<12x8xf32>
    %cst_53 = arith.constant dense<0xFF800000> : vector<12xf32>
    %184 = vector.multi_reduction <maximumf>, %183, %cst_53 [1] : vector<12x8xf32> to vector<12xf32>
    %185 = vector.shape_cast %184 : vector<12xf32> to vector<12x1xf32>
    %186 = vector.broadcast %185 : vector<12x1xf32> to vector<12x8xf32>
    %187 = arith.subf %183, %186 : vector<12x8xf32>
    %188 = math.exp %187 : vector<12x8xf32>
    %cst_54 = arith.constant dense<0.000000e+00> : vector<12xf32>
    %189 = vector.multi_reduction <add>, %188, %cst_54 [1] : vector<12x8xf32> to vector<12xf32>
    %190 = vector.shape_cast %189 : vector<12xf32> to vector<12x1xf32>
    %191 = tpu.reciprocal %190 {approx = true} : vector<12x1xf32> -> vector<12x1xf32>
    %192 = vector.broadcast %191 : vector<12x1xf32> to vector<12x8xf32>
    %193 = arith.mulf %188, %192 : vector<12x8xf32>
    %194 = arith.truncf %193 : vector<12x8xf32> to vector<12x8xbf16>
    %cst_55 = arith.constant dense<0.000000e+00> : vector<12x8xf32>
    %195 = tpu.matmul %194, %182, %cst_55 {dimension_numbers = #tpu.dot_dimension_numbers<[1], [0], [0], [1], [0, 0, 1, 1], [], []>} : vector<12x8xbf16>, vector<8x8xbf16>, vector<12x8xf32> -> vector<12x8xf32>
    %196 = vector.extract_strided_slice %73 {offsets = [0, 24], sizes = [12, 8], strides = [1, 1]} : vector<12x96xbf16> to vector<12x8xbf16>
    %197 = vector.extract_strided_slice %68 {offsets = [0, 56], sizes = [8, 8], strides = [1, 1]} : vector<8x96xbf16> to vector<8x8xbf16>
    %198 = vector.extract_strided_slice %68 {offsets = [0, 88], sizes = [8, 8], strides = [1, 1]} : vector<8x96xbf16> to vector<8x8xbf16>
    %cst_56 = arith.constant dense<0.000000e+00> : vector<12x8xf32>
    %199 = tpu.matmul %196, %197, %cst_56 {dimension_numbers = #tpu.dot_dimension_numbers<[1], [1], [0], [0], [0, 0, 1, 0], [], []>} : vector<12x8xbf16>, vector<8x8xbf16>, vector<12x8xf32> -> vector<12x8xf32>
    %cst_57 = arith.constant dense<0xFF800000> : vector<12xf32>
    %200 = vector.multi_reduction <maximumf>, %199, %cst_57 [1] : vector<12x8xf32> to vector<12xf32>
    %201 = vector.shape_cast %200 : vector<12xf32> to vector<12x1xf32>
    %202 = vector.broadcast %201 : vector<12x1xf32> to vector<12x8xf32>
    %203 = arith.subf %199, %202 : vector<12x8xf32>
    %204 = math.exp %203 : vector<12x8xf32>
    %cst_58 = arith.constant dense<0.000000e+00> : vector<12xf32>
    %205 = vector.multi_reduction <add>, %204, %cst_58 [1] : vector<12x8xf32> to vector<12xf32>
    %206 = vector.shape_cast %205 : vector<12xf32> to vector<12x1xf32>
    %207 = tpu.reciprocal %206 {approx = true} : vector<12x1xf32> -> vector<12x1xf32>
    %208 = vector.broadcast %207 : vector<12x1xf32> to vector<12x8xf32>
    %209 = arith.mulf %204, %208 : vector<12x8xf32>
    %210 = arith.truncf %209 : vector<12x8xf32> to vector<12x8xbf16>
    %cst_59 = arith.constant dense<0.000000e+00> : vector<12x8xf32>
    %211 = tpu.matmul %210, %198, %cst_59 {dimension_numbers = #tpu.dot_dimension_numbers<[1], [0], [0], [1], [0, 0, 1, 1], [], []>} : vector<12x8xbf16>, vector<8x8xbf16>, vector<12x8xf32> -> vector<12x8xf32>
    %212 = tpu.concatenate %163, %179, %195, %211 in 1 : vector<12x8xf32>, vector<12x8xf32>, vector<12x8xf32>, vector<12x8xf32> -> vector<12x32xf32>
    %213 = arith.truncf %212 : vector<12x32xf32> to vector<12x32xbf16>
    %cst_60 = arith.constant dense<0.000000e+00> : vector<12x32xf32>
    %214 = tpu.matmul %213, %11, %cst_60 {dimension_numbers = #tpu.dot_dimension_numbers<[1], [0], [0], [1], [0, 0, 1, 1], [], []>} : vector<12x32xbf16>, vector<32x32xbf16>, vector<12x32xf32> -> vector<12x32xf32>
    %215 = vector.broadcast %6 : vector<1x32xf32> to vector<12x32xf32>
    %216 = arith.addf %214, %215 : vector<12x32xf32>
    %217 = arith.addf %63, %216 : vector<12x32xf32>
    %cst_61 = arith.constant 5.000000e-01 : f32
    %218 = vector.broadcast %cst_61 : f32 to vector<12x32xf32>
    %219 = arith.mulf %217, %218 : vector<12x32xf32>
    %cst_62 = arith.constant dense<0xFF800000> : vector<32xf32>
    %220 = vector.multi_reduction <maximumf>, %219, %cst_62 [0] : vector<12x32xf32> to vector<32xf32>
    %221 = vector.shape_cast %220 : vector<32xf32> to vector<1x32xf32>
    %c1 = arith.constant 1 : index
    %c0_63 = arith.constant 0 : index
    %c0_64 = arith.constant 0 : index
    %222 = vector.load %arg1[%c1, %c0_63, %c0_64] : memref<2x8x32xf32, #tpu.memory_space<vmem>>, vector<1x8x32xf32>
    %223 = vector.shape_cast %222 : vector<1x8x32xf32> to vector<8x32xf32>
    %cst_65 = arith.constant dense<0.000000e+00> : vector<8xf32>
    %224 = vector.multi_reduction <add>, %223, %cst_65 [1] : vector<8x32xf32> to vector<8xf32>
    %225 = vector.shape_cast %224 : vector<8xf32> to vector<8x1xf32>
    %cst_66 = arith.constant 3.200000e+01 : f32
    %226 = vector.broadcast %cst_66 : f32 to vector<8x1xf32>
    %227 = arith.divf %225, %226 : vector<8x1xf32>
    %228 = vector.broadcast %227 : vector<8x1xf32> to vector<8x32xf32>
    %229 = arith.subf %223, %228 : vector<8x32xf32>
    %230 = arith.mulf %229, %229 : vector<8x32xf32>
    %cst_67 = arith.constant dense<0.000000e+00> : vector<8xf32>
    %231 = vector.multi_reduction <add>, %230, %cst_67 [1] : vector<8x32xf32> to vector<8xf32>
    %232 = vector.shape_cast %231 : vector<8xf32> to vector<8x1xf32>
    %cst_68 = arith.constant 3.200000e+01 : f32
    %233 = vector.broadcast %cst_68 : f32 to vector<8x1xf32>
    %234 = arith.divf %232, %233 : vector<8x1xf32>
    %235 = vector.broadcast %227 : vector<8x1xf32> to vector<8x32xf32>
    %236 = arith.subf %223, %235 : vector<8x32xf32>
    %cst_69 = arith.constant 9.99999974E-6 : f32
    %237 = vector.broadcast %cst_69 : f32 to vector<8x1xf32>
    %238 = arith.addf %234, %237 : vector<8x1xf32>
    %239 = math.rsqrt %238 : vector<8x1xf32>
    %240 = vector.broadcast %239 : vector<8x1xf32> to vector<8x32xf32>
    %241 = arith.mulf %236, %240 : vector<8x32xf32>
    %242 = vector.broadcast %1 : vector<1x32xf32> to vector<8x32xf32>
    %243 = arith.mulf %241, %242 : vector<8x32xf32>
    %244 = vector.broadcast %2 : vector<1x32xf32> to vector<8x32xf32>
    %245 = arith.addf %243, %244 : vector<8x32xf32>
    %c1_70 = arith.constant 1 : index
    %c0_71 = arith.constant 0 : index
    %c0_72 = arith.constant 0 : index
    %246 = vector.load %arg2[%c1_70, %c0_71, %c0_72] : memref<2x12x32xf32, #tpu.memory_space<vmem>>, vector<1x12x32xf32>
    %247 = vector.shape_cast %246 : vector<1x12x32xf32> to vector<12x32xf32>
    %cst_73 = arith.constant dense<0.000000e+00> : vector<12xf32>
    %248 = vector.multi_reduction <add>, %247, %cst_73 [1] : vector<12x32xf32> to vector<12xf32>
    %249 = vector.shape_cast %248 : vector<12xf32> to vector<12x1xf32>
    %cst_74 = arith.constant 3.200000e+01 : f32
    %250 = vector.broadcast %cst_74 : f32 to vector<12x1xf32>
    %251 = arith.divf %249, %250 : vector<12x1xf32>
    %252 = vector.broadcast %251 : vector<12x1xf32> to vector<12x32xf32>
    %253 = arith.subf %247, %252 : vector<12x32xf32>
    %254 = arith.mulf %253, %253 : vector<12x32xf32>
    %cst_75 = arith.constant dense<0.000000e+00> : vector<12xf32>
    %255 = vector.multi_reduction <add>, %254, %cst_75 [1] : vector<12x32xf32> to vector<12xf32>
    %256 = vector.shape_cast %255 : vector<12xf32> to vector<12x1xf32>
    %cst_76 = arith.constant 3.200000e+01 : f32
    %257 = vector.broadcast %cst_76 : f32 to vector<12x1xf32>
    %258 = arith.divf %256, %257 : vector<12x1xf32>
    %259 = vector.broadcast %251 : vector<12x1xf32> to vector<12x32xf32>
    %260 = arith.subf %247, %259 : vector<12x32xf32>
    %cst_77 = arith.constant 9.99999974E-6 : f32
    %261 = vector.broadcast %cst_77 : f32 to vector<12x1xf32>
    %262 = arith.addf %258, %261 : vector<12x1xf32>
    %263 = math.rsqrt %262 : vector<12x1xf32>
    %264 = vector.broadcast %263 : vector<12x1xf32> to vector<12x32xf32>
    %265 = arith.mulf %260, %264 : vector<12x32xf32>
    %266 = vector.broadcast %3 : vector<1x32xf32> to vector<12x32xf32>
    %267 = arith.mulf %265, %266 : vector<12x32xf32>
    %268 = vector.broadcast %4 : vector<1x32xf32> to vector<12x32xf32>
    %269 = arith.addf %267, %268 : vector<12x32xf32>
    %270 = arith.truncf %245 : vector<8x32xf32> to vector<8x32xbf16>
    %cst_78 = arith.constant dense<0.000000e+00> : vector<8x96xf32>
    %271 = tpu.matmul %270, %10, %cst_78 {dimension_numbers = #tpu.dot_dimension_numbers<[1], [0], [0], [1], [0, 0, 1, 1], [], []>} : vector<8x32xbf16>, vector<32x96xbf16>, vector<8x96xf32> -> vector<8x96xf32>
    %272 = vector.broadcast %5 : vector<1x96xf32> to vector<8x96xf32>
    %273 = arith.addf %271, %272 : vector<8x96xf32>
    %274 = arith.truncf %273 : vector<8x96xf32> to vector<8x96xbf16>
    %275 = arith.truncf %269 : vector<12x32xf32> to vector<12x32xbf16>
    %cst_79 = arith.constant dense<0.000000e+00> : vector<12x96xf32>
    %276 = tpu.matmul %275, %10, %cst_79 {dimension_numbers = #tpu.dot_dimension_numbers<[1], [0], [0], [1], [0, 0, 1, 1], [], []>} : vector<12x32xbf16>, vector<32x96xbf16>, vector<12x96xf32> -> vector<12x96xf32>
    %277 = vector.broadcast %5 : vector<1x96xf32> to vector<12x96xf32>
    %278 = arith.addf %276, %277 : vector<12x96xf32>
    %279 = arith.truncf %278 : vector<12x96xf32> to vector<12x96xbf16>
    %280 = vector.extract_strided_slice %274 {offsets = [0, 0], sizes = [8, 8], strides = [1, 1]} : vector<8x96xbf16> to vector<8x8xbf16>
    %281 = vector.extract_strided_slice %279 {offsets = [0, 32], sizes = [12, 8], strides = [1, 1]} : vector<12x96xbf16> to vector<12x8xbf16>
    %282 = vector.extract_strided_slice %279 {offsets = [0, 64], sizes = [12, 8], strides = [1, 1]} : vector<12x96xbf16> to vector<12x8xbf16>
    %cst_80 = arith.constant dense<0.000000e+00> : vector<8x12xf32>
    %283 = tpu.matmul %280, %281, %cst_80 {dimension_numbers = #tpu.dot_dimension_numbers<[1], [1], [0], [0], [0, 0, 1, 0], [], []>} : vector<8x8xbf16>, vector<12x8xbf16>, vector<8x12xf32> -> vector<8x12xf32>
    %cst_81 = arith.constant dense<0xFF800000> : vector<8xf32>
    %284 = vector.multi_reduction <maximumf>, %283, %cst_81 [1] : vector<8x12xf32> to vector<8xf32>
    %285 = vector.shape_cast %284 : vector<8xf32> to vector<8x1xf32>
    %286 = vector.broadcast %285 : vector<8x1xf32> to vector<8x12xf32>
    %287 = arith.subf %283, %286 : vector<8x12xf32>
    %288 = math.exp %287 : vector<8x12xf32>
    %cst_82 = arith.constant dense<0.000000e+00> : vector<8xf32>
    %289 = vector.multi_reduction <add>, %288, %cst_82 [1] : vector<8x12xf32> to vector<8xf32>
    %290 = vector.shape_cast %289 : vector<8xf32> to vector<8x1xf32>
    %291 = tpu.reciprocal %290 {approx = true} : vector<8x1xf32> -> vector<8x1xf32>
    %292 = vector.broadcast %291 : vector<8x1xf32> to vector<8x12xf32>
    %293 = arith.mulf %288, %292 : vector<8x12xf32>
    %294 = arith.truncf %293 : vector<8x12xf32> to vector<8x12xbf16>
    %cst_83 = arith.constant dense<0.000000e+00> : vector<8x8xf32>
    %295 = tpu.matmul %294, %282, %cst_83 {dimension_numbers = #tpu.dot_dimension_numbers<[1], [0], [0], [1], [0, 0, 1, 1], [], []>} : vector<8x12xbf16>, vector<12x8xbf16>, vector<8x8xf32> -> vector<8x8xf32>
    %296 = vector.extract_strided_slice %274 {offsets = [0, 8], sizes = [8, 8], strides = [1, 1]} : vector<8x96xbf16> to vector<8x8xbf16>
    %297 = vector.extract_strided_slice %279 {offsets = [0, 40], sizes = [12, 8], strides = [1, 1]} : vector<12x96xbf16> to vector<12x8xbf16>
    %298 = vector.extract_strided_slice %279 {offsets = [0, 72], sizes = [12, 8], strides = [1, 1]} : vector<12x96xbf16> to vector<12x8xbf16>
    %cst_84 = arith.constant dense<0.000000e+00> : vector<8x12xf32>
    %299 = tpu.matmul %296, %297, %cst_84 {dimension_numbers = #tpu.dot_dimension_numbers<[1], [1], [0], [0], [0, 0, 1, 0], [], []>} : vector<8x8xbf16>, vector<12x8xbf16>, vector<8x12xf32> -> vector<8x12xf32>
    %cst_85 = arith.constant dense<0xFF800000> : vector<8xf32>
    %300 = vector.multi_reduction <maximumf>, %299, %cst_85 [1] : vector<8x12xf32> to vector<8xf32>
    %301 = vector.shape_cast %300 : vector<8xf32> to vector<8x1xf32>
    %302 = vector.broadcast %301 : vector<8x1xf32> to vector<8x12xf32>
    %303 = arith.subf %299, %302 : vector<8x12xf32>
    %304 = math.exp %303 : vector<8x12xf32>
    %cst_86 = arith.constant dense<0.000000e+00> : vector<8xf32>
    %305 = vector.multi_reduction <add>, %304, %cst_86 [1] : vector<8x12xf32> to vector<8xf32>
    %306 = vector.shape_cast %305 : vector<8xf32> to vector<8x1xf32>
    %307 = tpu.reciprocal %306 {approx = true} : vector<8x1xf32> -> vector<8x1xf32>
    %308 = vector.broadcast %307 : vector<8x1xf32> to vector<8x12xf32>
    %309 = arith.mulf %304, %308 : vector<8x12xf32>
    %310 = arith.truncf %309 : vector<8x12xf32> to vector<8x12xbf16>
    %cst_87 = arith.constant dense<0.000000e+00> : vector<8x8xf32>
    %311 = tpu.matmul %310, %298, %cst_87 {dimension_numbers = #tpu.dot_dimension_numbers<[1], [0], [0], [1], [0, 0, 1, 1], [], []>} : vector<8x12xbf16>, vector<12x8xbf16>, vector<8x8xf32> -> vector<8x8xf32>
    %312 = vector.extract_strided_slice %274 {offsets = [0, 16], sizes = [8, 8], strides = [1, 1]} : vector<8x96xbf16> to vector<8x8xbf16>
    %313 = vector.extract_strided_slice %279 {offsets = [0, 48], sizes = [12, 8], strides = [1, 1]} : vector<12x96xbf16> to vector<12x8xbf16>
    %314 = vector.extract_strided_slice %279 {offsets = [0, 80], sizes = [12, 8], strides = [1, 1]} : vector<12x96xbf16> to vector<12x8xbf16>
    %cst_88 = arith.constant dense<0.000000e+00> : vector<8x12xf32>
    %315 = tpu.matmul %312, %313, %cst_88 {dimension_numbers = #tpu.dot_dimension_numbers<[1], [1], [0], [0], [0, 0, 1, 0], [], []>} : vector<8x8xbf16>, vector<12x8xbf16>, vector<8x12xf32> -> vector<8x12xf32>
    %cst_89 = arith.constant dense<0xFF800000> : vector<8xf32>
    %316 = vector.multi_reduction <maximumf>, %315, %cst_89 [1] : vector<8x12xf32> to vector<8xf32>
    %317 = vector.shape_cast %316 : vector<8xf32> to vector<8x1xf32>
    %318 = vector.broadcast %317 : vector<8x1xf32> to vector<8x12xf32>
    %319 = arith.subf %315, %318 : vector<8x12xf32>
    %320 = math.exp %319 : vector<8x12xf32>
    %cst_90 = arith.constant dense<0.000000e+00> : vector<8xf32>
    %321 = vector.multi_reduction <add>, %320, %cst_90 [1] : vector<8x12xf32> to vector<8xf32>
    %322 = vector.shape_cast %321 : vector<8xf32> to vector<8x1xf32>
    %323 = tpu.reciprocal %322 {approx = true} : vector<8x1xf32> -> vector<8x1xf32>
    %324 = vector.broadcast %323 : vector<8x1xf32> to vector<8x12xf32>
    %325 = arith.mulf %320, %324 : vector<8x12xf32>
    %326 = arith.truncf %325 : vector<8x12xf32> to vector<8x12xbf16>
    %cst_91 = arith.constant dense<0.000000e+00> : vector<8x8xf32>
    %327 = tpu.matmul %326, %314, %cst_91 {dimension_numbers = #tpu.dot_dimension_numbers<[1], [0], [0], [1], [0, 0, 1, 1], [], []>} : vector<8x12xbf16>, vector<12x8xbf16>, vector<8x8xf32> -> vector<8x8xf32>
    %328 = vector.extract_strided_slice %274 {offsets = [0, 24], sizes = [8, 8], strides = [1, 1]} : vector<8x96xbf16> to vector<8x8xbf16>
    %329 = vector.extract_strided_slice %279 {offsets = [0, 56], sizes = [12, 8], strides = [1, 1]} : vector<12x96xbf16> to vector<12x8xbf16>
    %330 = vector.extract_strided_slice %279 {offsets = [0, 88], sizes = [12, 8], strides = [1, 1]} : vector<12x96xbf16> to vector<12x8xbf16>
    %cst_92 = arith.constant dense<0.000000e+00> : vector<8x12xf32>
    %331 = tpu.matmul %328, %329, %cst_92 {dimension_numbers = #tpu.dot_dimension_numbers<[1], [1], [0], [0], [0, 0, 1, 0], [], []>} : vector<8x8xbf16>, vector<12x8xbf16>, vector<8x12xf32> -> vector<8x12xf32>
    %cst_93 = arith.constant dense<0xFF800000> : vector<8xf32>
    %332 = vector.multi_reduction <maximumf>, %331, %cst_93 [1] : vector<8x12xf32> to vector<8xf32>
    %333 = vector.shape_cast %332 : vector<8xf32> to vector<8x1xf32>
    %334 = vector.broadcast %333 : vector<8x1xf32> to vector<8x12xf32>
    %335 = arith.subf %331, %334 : vector<8x12xf32>
    %336 = math.exp %335 : vector<8x12xf32>
    %cst_94 = arith.constant dense<0.000000e+00> : vector<8xf32>
    %337 = vector.multi_reduction <add>, %336, %cst_94 [1] : vector<8x12xf32> to vector<8xf32>
    %338 = vector.shape_cast %337 : vector<8xf32> to vector<8x1xf32>
    %339 = tpu.reciprocal %338 {approx = true} : vector<8x1xf32> -> vector<8x1xf32>
    %340 = vector.broadcast %339 : vector<8x1xf32> to vector<8x12xf32>
    %341 = arith.mulf %336, %340 : vector<8x12xf32>
    %342 = arith.truncf %341 : vector<8x12xf32> to vector<8x12xbf16>
    %cst_95 = arith.constant dense<0.000000e+00> : vector<8x8xf32>
    %343 = tpu.matmul %342, %330, %cst_95 {dimension_numbers = #tpu.dot_dimension_numbers<[1], [0], [0], [1], [0, 0, 1, 1], [], []>} : vector<8x12xbf16>, vector<12x8xbf16>, vector<8x8xf32> -> vector<8x8xf32>
    %344 = tpu.concatenate %295, %311, %327, %343 in 1 : vector<8x8xf32>, vector<8x8xf32>, vector<8x8xf32>, vector<8x8xf32> -> vector<8x32xf32>
    %345 = arith.truncf %344 : vector<8x32xf32> to vector<8x32xbf16>
    %cst_96 = arith.constant dense<0.000000e+00> : vector<8x32xf32>
    %346 = tpu.matmul %345, %11, %cst_96 {dimension_numbers = #tpu.dot_dimension_numbers<[1], [0], [0], [1], [0, 0, 1, 1], [], []>} : vector<8x32xbf16>, vector<32x32xbf16>, vector<8x32xf32> -> vector<8x32xf32>
    %347 = vector.broadcast %6 : vector<1x32xf32> to vector<8x32xf32>
    %348 = arith.addf %346, %347 : vector<8x32xf32>
    %349 = arith.addf %245, %348 : vector<8x32xf32>
    %cst_97 = arith.constant 5.000000e-01 : f32
    %350 = vector.broadcast %cst_97 : f32 to vector<8x32xf32>
    %351 = arith.mulf %349, %350 : vector<8x32xf32>
    %cst_98 = arith.constant dense<0xFF800000> : vector<32xf32>
    %352 = vector.multi_reduction <maximumf>, %351, %cst_98 [0] : vector<8x32xf32> to vector<32xf32>
    %353 = vector.shape_cast %352 : vector<32xf32> to vector<1x32xf32>
    %354 = vector.extract_strided_slice %279 {offsets = [0, 0], sizes = [12, 8], strides = [1, 1]} : vector<12x96xbf16> to vector<12x8xbf16>
    %355 = vector.extract_strided_slice %274 {offsets = [0, 32], sizes = [8, 8], strides = [1, 1]} : vector<8x96xbf16> to vector<8x8xbf16>
    %356 = vector.extract_strided_slice %274 {offsets = [0, 64], sizes = [8, 8], strides = [1, 1]} : vector<8x96xbf16> to vector<8x8xbf16>
    %cst_99 = arith.constant dense<0.000000e+00> : vector<12x8xf32>
    %357 = tpu.matmul %354, %355, %cst_99 {dimension_numbers = #tpu.dot_dimension_numbers<[1], [1], [0], [0], [0, 0, 1, 0], [], []>} : vector<12x8xbf16>, vector<8x8xbf16>, vector<12x8xf32> -> vector<12x8xf32>
    %cst_100 = arith.constant dense<0xFF800000> : vector<12xf32>
    %358 = vector.multi_reduction <maximumf>, %357, %cst_100 [1] : vector<12x8xf32> to vector<12xf32>
    %359 = vector.shape_cast %358 : vector<12xf32> to vector<12x1xf32>
    %360 = vector.broadcast %359 : vector<12x1xf32> to vector<12x8xf32>
    %361 = arith.subf %357, %360 : vector<12x8xf32>
    %362 = math.exp %361 : vector<12x8xf32>
    %cst_101 = arith.constant dense<0.000000e+00> : vector<12xf32>
    %363 = vector.multi_reduction <add>, %362, %cst_101 [1] : vector<12x8xf32> to vector<12xf32>
    %364 = vector.shape_cast %363 : vector<12xf32> to vector<12x1xf32>
    %365 = tpu.reciprocal %364 {approx = true} : vector<12x1xf32> -> vector<12x1xf32>
    %366 = vector.broadcast %365 : vector<12x1xf32> to vector<12x8xf32>
    %367 = arith.mulf %362, %366 : vector<12x8xf32>
    %368 = arith.truncf %367 : vector<12x8xf32> to vector<12x8xbf16>
    %cst_102 = arith.constant dense<0.000000e+00> : vector<12x8xf32>
    %369 = tpu.matmul %368, %356, %cst_102 {dimension_numbers = #tpu.dot_dimension_numbers<[1], [0], [0], [1], [0, 0, 1, 1], [], []>} : vector<12x8xbf16>, vector<8x8xbf16>, vector<12x8xf32> -> vector<12x8xf32>
    %370 = vector.extract_strided_slice %279 {offsets = [0, 8], sizes = [12, 8], strides = [1, 1]} : vector<12x96xbf16> to vector<12x8xbf16>
    %371 = vector.extract_strided_slice %274 {offsets = [0, 40], sizes = [8, 8], strides = [1, 1]} : vector<8x96xbf16> to vector<8x8xbf16>
    %372 = vector.extract_strided_slice %274 {offsets = [0, 72], sizes = [8, 8], strides = [1, 1]} : vector<8x96xbf16> to vector<8x8xbf16>
    %cst_103 = arith.constant dense<0.000000e+00> : vector<12x8xf32>
    %373 = tpu.matmul %370, %371, %cst_103 {dimension_numbers = #tpu.dot_dimension_numbers<[1], [1], [0], [0], [0, 0, 1, 0], [], []>} : vector<12x8xbf16>, vector<8x8xbf16>, vector<12x8xf32> -> vector<12x8xf32>
    %cst_104 = arith.constant dense<0xFF800000> : vector<12xf32>
    %374 = vector.multi_reduction <maximumf>, %373, %cst_104 [1] : vector<12x8xf32> to vector<12xf32>
    %375 = vector.shape_cast %374 : vector<12xf32> to vector<12x1xf32>
    %376 = vector.broadcast %375 : vector<12x1xf32> to vector<12x8xf32>
    %377 = arith.subf %373, %376 : vector<12x8xf32>
    %378 = math.exp %377 : vector<12x8xf32>
    %cst_105 = arith.constant dense<0.000000e+00> : vector<12xf32>
    %379 = vector.multi_reduction <add>, %378, %cst_105 [1] : vector<12x8xf32> to vector<12xf32>
    %380 = vector.shape_cast %379 : vector<12xf32> to vector<12x1xf32>
    %381 = tpu.reciprocal %380 {approx = true} : vector<12x1xf32> -> vector<12x1xf32>
    %382 = vector.broadcast %381 : vector<12x1xf32> to vector<12x8xf32>
    %383 = arith.mulf %378, %382 : vector<12x8xf32>
    %384 = arith.truncf %383 : vector<12x8xf32> to vector<12x8xbf16>
    %cst_106 = arith.constant dense<0.000000e+00> : vector<12x8xf32>
    %385 = tpu.matmul %384, %372, %cst_106 {dimension_numbers = #tpu.dot_dimension_numbers<[1], [0], [0], [1], [0, 0, 1, 1], [], []>} : vector<12x8xbf16>, vector<8x8xbf16>, vector<12x8xf32> -> vector<12x8xf32>
    %386 = vector.extract_strided_slice %279 {offsets = [0, 16], sizes = [12, 8], strides = [1, 1]} : vector<12x96xbf16> to vector<12x8xbf16>
    %387 = vector.extract_strided_slice %274 {offsets = [0, 48], sizes = [8, 8], strides = [1, 1]} : vector<8x96xbf16> to vector<8x8xbf16>
    %388 = vector.extract_strided_slice %274 {offsets = [0, 80], sizes = [8, 8], strides = [1, 1]} : vector<8x96xbf16> to vector<8x8xbf16>
    %cst_107 = arith.constant dense<0.000000e+00> : vector<12x8xf32>
    %389 = tpu.matmul %386, %387, %cst_107 {dimension_numbers = #tpu.dot_dimension_numbers<[1], [1], [0], [0], [0, 0, 1, 0], [], []>} : vector<12x8xbf16>, vector<8x8xbf16>, vector<12x8xf32> -> vector<12x8xf32>
    %cst_108 = arith.constant dense<0xFF800000> : vector<12xf32>
    %390 = vector.multi_reduction <maximumf>, %389, %cst_108 [1] : vector<12x8xf32> to vector<12xf32>
    %391 = vector.shape_cast %390 : vector<12xf32> to vector<12x1xf32>
    %392 = vector.broadcast %391 : vector<12x1xf32> to vector<12x8xf32>
    %393 = arith.subf %389, %392 : vector<12x8xf32>
    %394 = math.exp %393 : vector<12x8xf32>
    %cst_109 = arith.constant dense<0.000000e+00> : vector<12xf32>
    %395 = vector.multi_reduction <add>, %394, %cst_109 [1] : vector<12x8xf32> to vector<12xf32>
    %396 = vector.shape_cast %395 : vector<12xf32> to vector<12x1xf32>
    %397 = tpu.reciprocal %396 {approx = true} : vector<12x1xf32> -> vector<12x1xf32>
    %398 = vector.broadcast %397 : vector<12x1xf32> to vector<12x8xf32>
    %399 = arith.mulf %394, %398 : vector<12x8xf32>
    %400 = arith.truncf %399 : vector<12x8xf32> to vector<12x8xbf16>
    %cst_110 = arith.constant dense<0.000000e+00> : vector<12x8xf32>
    %401 = tpu.matmul %400, %388, %cst_110 {dimension_numbers = #tpu.dot_dimension_numbers<[1], [0], [0], [1], [0, 0, 1, 1], [], []>} : vector<12x8xbf16>, vector<8x8xbf16>, vector<12x8xf32> -> vector<12x8xf32>
    %402 = vector.extract_strided_slice %279 {offsets = [0, 24], sizes = [12, 8], strides = [1, 1]} : vector<12x96xbf16> to vector<12x8xbf16>
    %403 = vector.extract_strided_slice %274 {offsets = [0, 56], sizes = [8, 8], strides = [1, 1]} : vector<8x96xbf16> to vector<8x8xbf16>
    %404 = vector.extract_strided_slice %274 {offsets = [0, 88], sizes = [8, 8], strides = [1, 1]} : vector<8x96xbf16> to vector<8x8xbf16>
    %cst_111 = arith.constant dense<0.000000e+00> : vector<12x8xf32>
    %405 = tpu.matmul %402, %403, %cst_111 {dimension_numbers = #tpu.dot_dimension_numbers<[1], [1], [0], [0], [0, 0, 1, 0], [], []>} : vector<12x8xbf16>, vector<8x8xbf16>, vector<12x8xf32> -> vector<12x8xf32>
    %cst_112 = arith.constant dense<0xFF800000> : vector<12xf32>
    %406 = vector.multi_reduction <maximumf>, %405, %cst_112 [1] : vector<12x8xf32> to vector<12xf32>
    %407 = vector.shape_cast %406 : vector<12xf32> to vector<12x1xf32>
    %408 = vector.broadcast %407 : vector<12x1xf32> to vector<12x8xf32>
    %409 = arith.subf %405, %408 : vector<12x8xf32>
    %410 = math.exp %409 : vector<12x8xf32>
    %cst_113 = arith.constant dense<0.000000e+00> : vector<12xf32>
    %411 = vector.multi_reduction <add>, %410, %cst_113 [1] : vector<12x8xf32> to vector<12xf32>
    %412 = vector.shape_cast %411 : vector<12xf32> to vector<12x1xf32>
    %413 = tpu.reciprocal %412 {approx = true} : vector<12x1xf32> -> vector<12x1xf32>
    %414 = vector.broadcast %413 : vector<12x1xf32> to vector<12x8xf32>
    %415 = arith.mulf %410, %414 : vector<12x8xf32>
    %416 = arith.truncf %415 : vector<12x8xf32> to vector<12x8xbf16>
    %cst_114 = arith.constant dense<0.000000e+00> : vector<12x8xf32>
    %417 = tpu.matmul %416, %404, %cst_114 {dimension_numbers = #tpu.dot_dimension_numbers<[1], [0], [0], [1], [0, 0, 1, 1], [], []>} : vector<12x8xbf16>, vector<8x8xbf16>, vector<12x8xf32> -> vector<12x8xf32>
    %418 = tpu.concatenate %369, %385, %401, %417 in 1 : vector<12x8xf32>, vector<12x8xf32>, vector<12x8xf32>, vector<12x8xf32> -> vector<12x32xf32>
    %419 = arith.truncf %418 : vector<12x32xf32> to vector<12x32xbf16>
    %cst_115 = arith.constant dense<0.000000e+00> : vector<12x32xf32>
    %420 = tpu.matmul %419, %11, %cst_115 {dimension_numbers = #tpu.dot_dimension_numbers<[1], [0], [0], [1], [0, 0, 1, 1], [], []>} : vector<12x32xbf16>, vector<32x32xbf16>, vector<12x32xf32> -> vector<12x32xf32>
    %421 = vector.broadcast %6 : vector<1x32xf32> to vector<12x32xf32>
    %422 = arith.addf %420, %421 : vector<12x32xf32>
    %423 = arith.addf %269, %422 : vector<12x32xf32>
    %cst_116 = arith.constant 5.000000e-01 : f32
    %424 = vector.broadcast %cst_116 : f32 to vector<12x32xf32>
    %425 = arith.mulf %423, %424 : vector<12x32xf32>
    %cst_117 = arith.constant dense<0xFF800000> : vector<32xf32>
    %426 = vector.multi_reduction <maximumf>, %425, %cst_117 [0] : vector<12x32xf32> to vector<32xf32>
    %427 = vector.shape_cast %426 : vector<32xf32> to vector<1x32xf32>
    %428 = tpu.concatenate %147, %353 in 0 : vector<1x32xf32>, vector<1x32xf32> -> vector<2x32xf32>
    %429 = arith.truncf %428 : vector<2x32xf32> to vector<2x32xbf16>
    %430 = tpu.concatenate %221, %427 in 0 : vector<1x32xf32>, vector<1x32xf32> -> vector<2x32xf32>
    %431 = arith.truncf %430 : vector<2x32xf32> to vector<2x32xbf16>
    %cst_118 = arith.constant dense<0.000000e+00> : vector<2x64xf32>
    %432 = tpu.matmul %429, %12, %cst_118 {dimension_numbers = #tpu.dot_dimension_numbers<[1], [0], [0], [1], [0, 0, 1, 1], [], []>} : vector<2x32xbf16>, vector<32x64xbf16>, vector<2x64xf32> -> vector<2x64xf32>
    %cst_119 = arith.constant dense<0.000000e+00> : vector<2x64xf32>
    %433 = tpu.matmul %431, %13, %cst_119 {dimension_numbers = #tpu.dot_dimension_numbers<[1], [0], [0], [1], [0, 0, 1, 1], [], []>} : vector<2x32xbf16>, vector<32x64xbf16>, vector<2x64xf32> -> vector<2x64xf32>
    %434 = arith.addf %432, %433 : vector<2x64xf32>
    %435 = vector.broadcast %7 : vector<1x64xf32> to vector<2x64xf32>
    %436 = arith.addf %434, %435 : vector<2x64xf32>
    %cst_120 = arith.constant 0.000000e+00 : f32
    %437 = vector.broadcast %cst_120 : f32 to vector<2x64xf32>
    %438 = arith.maximumf %436, %437 : vector<2x64xf32>
    %439 = arith.truncf %438 : vector<2x64xf32> to vector<2x64xbf16>
    %cst_121 = arith.constant dense<0.000000e+00> : vector<2x32xf32>
    %440 = tpu.matmul %439, %14, %cst_121 {dimension_numbers = #tpu.dot_dimension_numbers<[1], [0], [0], [1], [0, 0, 1, 1], [], []>} : vector<2x64xbf16>, vector<64x32xbf16>, vector<2x32xf32> -> vector<2x32xf32>
    %441 = vector.broadcast %8 : vector<1x32xf32> to vector<2x32xf32>
    %442 = arith.addf %440, %441 : vector<2x32xf32>
    %cst_122 = arith.constant 0.000000e+00 : f32
    %443 = vector.broadcast %cst_122 : f32 to vector<2x32xf32>
    %444 = arith.maximumf %442, %443 : vector<2x32xf32>
    %445 = arith.truncf %444 : vector<2x32xf32> to vector<2x32xbf16>
    %cst_123 = arith.constant dense<0.000000e+00> : vector<2x2xf32>
    %446 = tpu.matmul %445, %15, %cst_123 {dimension_numbers = #tpu.dot_dimension_numbers<[1], [0], [0], [1], [0, 0, 1, 1], [], []>} : vector<2x32xbf16>, vector<32x2xbf16>, vector<2x2xf32> -> vector<2x2xf32>
    %447 = vector.broadcast %9 : vector<1x2xf32> to vector<2x2xf32>
    %448 = arith.addf %446, %447 : vector<2x2xf32>
    %c0_124 = arith.constant 0 : index
    %c0_125 = arith.constant 0 : index
    %449 = vector.load %arg5[%c0_124, %c0_125] : memref<2x2xf32, #tpu.memory_space<vmem>>, vector<2x2xf32>
    tpu.vector_store %arg5[%c0_124, %c0_125], %448 {strides = array<i32>} : memref<2x2xf32, #tpu.memory_space<vmem>>, vector<2x2xf32>,
    return
  }
  func.func @transform_0(%arg0: i32) -> (i32, i32, i32) {
    %c0_i32 = arith.constant 0 : i32
    %c0_i32_0 = arith.constant 0 : i32
    %c0_i32_1 = arith.constant 0 : i32
    return %arg0, %c0_i32, %c0_i32_0 : i32, i32, i32
  }
  func.func @transform_1(%arg0: i32) -> (i32, i32, i32) {
    %c0_i32 = arith.constant 0 : i32
    %c0_i32_0 = arith.constant 0 : i32
    %c0_i32_1 = arith.constant 0 : i32
    return %arg0, %c0_i32, %c0_i32_0 : i32, i32, i32
  }
  func.func @transform_2(%arg0: i32) -> (i32, i32) {
    %c0_i32 = arith.constant 0 : i32
    %c0_i32_0 = arith.constant 0 : i32
    %c0_i32_1 = arith.constant 0 : i32
    return %c0_i32, %c0_i32_0 : i32, i32
  }
  func.func @transform_3(%arg0: i32) -> (i32, i32) {
    %c0_i32 = arith.constant 0 : i32
    %c0_i32_0 = arith.constant 0 : i32
    %c0_i32_1 = arith.constant 0 : i32
    return %c0_i32, %c0_i32_0 : i32, i32
  }
  func.func @transform_4(%arg0: i32) -> (i32, i32) {
    %c0_i32 = arith.constant 0 : i32
    %c0_i32_0 = arith.constant 0 : i32
    return %arg0, %c0_i32 : i32, i32
  }
}

</mosaic_0001>

<bundles_post_ra>
// kernel: tpu_custom_call.1
= control target key start
LH: loop header
LB: loop body
LE: loop exit
PB: predicated region body
PF: predicated region fallthrough
CT: control target
= control target key end

     0   :  { %vm49_vm0 = vcmask 261120   ;;  %vm79_vm1 = vcmask 257024   ;;  %s4212_s0 = inlined_call_operand.vmem [shape: f32[2,8,32], index: 0, kind: input, shape index: {}]   ;;  %s4213_s1 = inlined_call_operand.vmem [shape: f32[2,12,32], index: 1, kind: input, shape index: {}]   ;;  %s4214_s2 = inlined_call_operand.vmem [shape: f32[3,128], index: 2, kind: input, shape index: {}]   ;;  %s4215_s3 = inlined_call_operand.vmem [shape: bf16[224,96], index: 3, kind: input, shape index: {}]   ;;  %s4216_s4 = inlined_call_operand.hbm [shape: f32[2,2], index: 4, kind: output, shape index: {}]  }
   0x1   :  { %v74_v0 = vld [vmem:[%s4213_s1] sm:$0xff]  ;;  %v75_v1 = vld [vmem:[%s4213_s1 + $0x8] sm:$0xf] }
   0x2   :  { %v48_v2 = vld [vmem:[%s4212_s0] sm:$0xff]  ;;  %v76_v3 = vsel %vm49_vm0, %v74_v0, 0.0  ;;  %v80_v4 = vsel %vm79_vm1, %v75_v1, 0.0 }
   0x3   :  { %v50_v5 = vsel %vm49_vm0, %v48_v2, 0.0  ;;  %77 = vadd.xlane.f32.xlu0 %v76_v3 }
   0x4   :  { %51 = vadd.xlane.f32.xlu1 %v50_v5 }
   0x7   :  { %81 = vadd.xlane.f32.xlu0 %v80_v4 }
   0x8   :  { %9 = vsyncpa [#allocation3], 0  ;;  %v64_v15 = vlaneseq  ;;  %v3541_v19 = vld [vmem:[%s4214_s2] sm:$0x7]  ;;  %s3478_s23 = smov 32   ;;  %s3479_s24 = smov 64  }
   0x9   :  { %v3553_v21 = vld [vmem:[%s4215_s3] sm:$0xff]   ;;  %v3480_v22 = vmov 0.0   ;;  %v3563_v24 = vld [vmem:[%s4215_s3 + $0x8] sm:$0xff]   ;;  %vm3481_vm2 = vmmov 0   ;;  %s3482_s29 = smov 96   ;;  %s3483_s30 = smov 88  }
   0xa   :  { %v3535_v17 = vshrl.u32 %v64_v15, 7  ;;  %2997 = vmatprep.subr.bf16.mxu1 %v3480_v22  ;;  %2989 = vmatprep.subr.bf16.mxu0 %v3480_v22  ;;  %s3484_s5 = smov 80   ;;  %s3485_s6 = smov 72   ;;  %vm223_vm3 = vcmask 64512   ;;  %vm270_vm4 = vcmask 97280   ;;  %vm288_vm5 = vcmask 1045504  }
   0xb   :  { %2998 = vmatpush3.bf16.msra.mxu1 %v3553_v21  ;;  %2990 = vmatpush3.bf16.msra.mxu0 %v3553_v21  ;;  %s3486_s7 = smov 120   ;;  %s3487_s8 = smov 112   ;;  %vm801_vm6 = vcmask 60416   ;;  %vm676_vm7 = vcmask 130048   ;;  %vm678_vm8 = vcmask 195584   ;;  %vm827_vm9 = vcmask 1043456  }
   0xc   :  { %v66_v18 = vsub.s32 0, %v3535_v17  ;;  %2999 = vmatprep.subr.bf16.mxu1 %v3480_v22  ;;  %2991 = vmatprep.subr.bf16.mxu0 %v3480_v22  ;;  %v116_v55 = vsub.s32 1, %v3535_v17  ;;  %s3488_s9 = smov 104   ;;  %s3489_s10 = smov 56   ;;  %vm2556_vm10 = vcmask 1040384   ;;  %vm2706_vm11 = vcmask 523264  }
   0xd   :  { %3001 = vmatprep.mubr.msk.bf16.mxu1 %vm3481_vm2, %v3480_v22  ;;  %2993 = vmatprep.mubr.msk.bf16.mxu0 %vm3481_vm2, %v3480_v22  ;;  %s3490_s11 = smov 48   ;;  %s3491_s12 = smov 40   ;;  %vm2810_vm12 = vcmask 9216  }
   0xe   :  { %v3544_v20 = vrot.slane %v3541_v19, %v66_v18  ;;  %v3607_v56 = vrot.slane %v3541_v19, %v116_v55  ;;  %s3492_s13 = smov 8   ;;  %s3493_s16 = smov 24  }
   0xf   :  { %3000 = vmatpush3.bf16.msra.mxu1 %v3563_v24  ;;  %2992 = vmatpush3.bf16.msra.mxu0 %v3563_v24  ;;  %s3494_s19 = smov 16   ;;  %s3495_s25 = smov [#allocation2]  }
  0x10   :  { %3005 = vmatprep.subr.bf16.mxu0 %v3480_v22  ;;  %3011 = vmatprep.subr.bf16.mxu1 %v3480_v22  ;;  %s2818_s26 = sshll.u32 %s3495_s25, 4  ;;  %s2819_s26 = int_to_ptr.vmem [resolvable:$true] %s2818_s26 }
  0x11   :  { %p3459_p1 = scmp.lt.s32.totalorder %s2819_s26, %s2819_s26 }
  0x90   :  { %v78_v6 = vpop.xlane.xlu0 %77 }
  0x91   :  { %v83_v7 = vmul.f32 0.03125, %v78_v6  ;;  %v52_v23 = vpop.xlane.xlu1 %51 }
  0x92   :  { %v54_v25 = vmul.f32 0.03125, %v52_v23 }
  0x93   :  { %v85_v8 = vsub.f32 %v74_v0, %v83_v7 }
  0x94   :  { %v82_v9 = vpop.xlane.xlu0 %81  ;;  %v55_v26 = vsub.f32 %v48_v2, %v54_v25 }
  0x95   :  { %v84_v10 = vmul.f32 0.03125, %v82_v9  ;;  %v87_v11 = vmul.f32 %v85_v8, %v85_v8 }
  0x96   :  { %v56_v27 = vmul.f32 %v55_v26, %v55_v26 }
  0x97   :  { %v86_v12 = vsub.f32 %v75_v1, %v84_v10  ;;  %v89_v13 = vsel %vm49_vm0, %v87_v11, 0.0 }
  0x98   :  { %90 = vadd.xlane.f32.xlu1 %v89_v13  ;;  %v57_v28 = vsel %vm49_vm0, %v56_v27, 0.0 }
  0x99   :  { %v88_v14 = vmul.f32 %v86_v12, %v86_v12 }
  0x9b   :  { %v92_v16 = vsel %vm79_vm1, %v88_v14, 0.0 }
  0x9c   :  { %93 = vadd.xlane.f32.xlu0 %v92_v16 }
  0xa9   :  { %108 = vrot.lane.b32.xlu1 %v3544_v20, %s3478_s23 }
  0xb2   :  { %103 = vrot.lane.b32.xlu0 %v3544_v20, %s3479_s24 }
  0xcd   :  { %58 = vadd.xlane.f32.xlu1 %v57_v28 }
  0xde   :  { %70 = vrot.lane.b32.xlu1 %v3544_v20, %s3482_s29 }
 0x125   :  { %v91_v29 = vpop.xlane.xlu1 %90 }
 0x126   :  { %v95_v30 = vmul.f32 0.03125, %v91_v29 }
 0x128   :  { %v97_v31 = vadd.f32 1e-05, %v95_v30 }
 0x129   :  { %v94_v32 = vpop.xlane.xlu0 %93  ;;  %v3581_v42 = vpop.permute.xlu1 %108 }
 0x12a   :  { %3343 = vrsqrt.f32 %v97_v31  ;;  %v96_v33 = vmul.f32 0.03125, %v94_v32 }
 0x12c   :  { %v98_v34 = vadd.f32 1e-05, %v96_v33 }
 0x12d   :  { %v3577_v37 = vpop.permute.xlu0 %103 }
 0x12e   :  { %3345 = vrsqrt.f32 %v98_v34 }
 0x134   :  { %v3344_v35 = vpop.eup %3343 }
 0x135   :  { %v101_v36 = vmul.f32 %v3344_v35, %v85_v8 }
 0x137   :  { %v106_v40 = vmul.f32 %v3577_v37, %v101_v36 }
 0x138   :  { %v3346_v38 = vpop.eup %3345 }
 0x139   :  { %v102_v39 = vmul.f32 %v3346_v38, %v86_v12  ;;  %v3584_v43 = vadd.f32 %v3581_v42, %v106_v40 }
 0x13b   :  { %v107_v41 = vmul.f32 %v3577_v37, %v102_v39 }
 0x13d   :  { %v3587_v44 = vadd.f32 %v3581_v42, %v107_v41 }
 0x13f   :  { %v174_v45 = vpack.c.bf16 %v3587_v44, %v3584_v43 }
 0x141   :  { %3002 = vmatmul.mubr.msk.bf16.vlgmr.msra.gmra.mrb[0].mxu1 %vm49_vm0, %v174_v45 }
 0x142   :  { %3013 = vmatprep.mubr.msk.bf16.mxu1 %vm3481_vm2, %v3480_v22 }
 0x15a   :  { %v59_v46 = vpop.xlane.xlu1 %58 }
 0x15b   :  { %v60_v47 = vmul.f32 0.03125, %v59_v46 }
 0x15d   :  { %v61_v48 = vadd.f32 1e-05, %v60_v47 }
 0x15e   :  { %v3594_v51 = vpop.permute.xlu1 %70 }
 0x15f   :  { %3347 = vrsqrt.f32 %v61_v48 }
 0x169   :  { %v3348_v49 = vpop.eup %3347 }
 0x16a   :  { %v63_v50 = vmul.f32 %v3348_v49, %v55_v26 }
 0x16c   :  { %v68_v52 = vmul.f32 %v3544_v20, %v63_v50 }
 0x16e   :  { %v3598_v53 = vadd.f32 %v3594_v51, %v68_v52 }
 0x170   :  { %v113_v54 = vpack.c.bf16 %v3598_v53, %v3598_v53 }
 0x172   :  { %2994 = vmatmul.mubr.msk.bf16.vlgmr.msra.gmra.mrb[0].mxu0 %vm49_vm0, %v113_v54 }
 0x173   :  { %3007 = vmatprep.mubr.msk.bf16.mxu0 %vm3481_vm2, %v3480_v22 }
 0x214   :  { %v212_v57 = vpop.f32.mrb[0].mxu1 }
 0x215   :  { %v3003_v58 = vpop.f32.mrb[1].mxu1  ;;  %v213_v60 = vadd.f32 %v212_v57, %v3607_v56 }
 0x216   :  { %v215_v59 = vpop.f32.mrb[2].mxu1 }
 0x217   :  { %v216_v61 = vadd.f32 %v215_v59, %v3607_v56  ;;  %v3004_v62 = vpop.f32.mrb[3].mxu1 }
 0x219   :  { %v3611_v63 = vpack.c.bf16 %v216_v61, %v213_v60 }
 0x21b   :  { %335 = vrot.lane.b32.xlu0 %v3611_v63, %s3483_s30  ;;  %221 = vrot.lane.b32.xlu1 %v3611_v63, %s3482_s29 }
 0x21f   :  { %445 = vrot.lane.b32.xlu0 %v3611_v63, %s3484_s5 }
 0x223   :  { %555 = vrot.lane.b32.xlu0 %v3611_v63, %s3485_s6 }
 0x245   :  { %v167_v0 = vpop.f32.mrb[0].mxu0 }
 0x246   :  { %v168_v1 = vadd.f32 %v167_v0, %v3607_v56  ;;  %v2995_v2 = vpop.f32.mrb[1].mxu0 }
 0x247   :  { %v170_v3 = vpop.f32.mrb[2].mxu0 }
 0x248   :  { %v3622_v4 = vpack.c.bf16 %v168_v1, %v168_v1  ;;  %v2996_v5 = vpop.f32.mrb[3].mxu0 }
 0x24a   :  { %333 = vrot.lane.b32.xlu1 %v3622_v4, %s3486_s7 }
 0x24e   :  { %443 = vrot.lane.b32.xlu1 %v3622_v4, %s3487_s8 }
 0x252   :  { %553 = vrot.lane.b32.xlu1 %v3622_v4, %s3488_s9 }
 0x28d   :  { %v222_v6 = vpop.permute.xlu1 %221  ;;  %v336_v8 = vpop.permute.xlu0 %335 }
 0x28e   :  { %v228_v7 = vsel %vm223_vm3, %v222_v6, 0  ;;  %v341_v9 = vsel %vm223_vm3, %v336_v8, 0 }
 0x28f   :  { %3006 = vmatpush3.bf16.xpose.msra.mxu0 %v228_v7 }
 0x290   :  { %3017 = vmatprep.subr.bf16.mxu0 %v3480_v22 }
 0x291   :  { %v446_v10 = vpop.permute.xlu0 %445 }
 0x292   :  { %v451_v12 = vsel %vm223_vm3, %v446_v10, 0 }
 0x295   :  { %v556_v13 = vpop.permute.xlu0 %555 }
 0x296   :  { %3008 = vmatmul.mubr.msk.bf16.vlgmr.msra.gmra.mrb[4].mxu0 %vm223_vm3, %v3622_v4  ;;  %v561_v15 = vsel %vm223_vm3, %v556_v13, 0 }
 0x297   :  { %3018 = vmatpush3.bf16.xpose.msra.mxu0 %v341_v9  ;;  %3019 = vmatprep.mubr.msk.bf16.mxu0 %vm3481_vm2, %v3480_v22 }
 0x298   :  { %3029 = vmatprep.subr.bf16.mxu0 %v3480_v22 }
 0x2bc   :  { %v334_v11 = vpop.permute.xlu1 %333 }
 0x2bd   :  { %3020 = vmatmul.mubr.msk.bf16.vlgmr.msra.gmra.mrb[8].mxu0 %vm223_vm3, %v334_v11 }
 0x2be   :  { %3030 = vmatpush3.bf16.xpose.msra.mxu0 %v451_v12  ;;  %3031 = vmatprep.mubr.msk.bf16.mxu0 %vm3481_vm2, %v3480_v22 }
 0x2bf   :  { %3041 = vmatprep.subr.bf16.mxu0 %v3480_v22 }
 0x2c0   :  { %v444_v14 = vpop.permute.xlu1 %443 }
 0x2c4   :  { %v554_v16 = vpop.permute.xlu1 %553 }
 0x2c5   :  { %3032 = vmatmul.mubr.msk.bf16.vlgmr.msra.gmra.mrb[12].mxu0 %vm223_vm3, %v444_v14 }
 0x2c6   :  { %3042 = vmatpush3.bf16.xpose.msra.mxu0 %v561_v15  ;;  %3043 = vmatprep.mubr.msk.bf16.mxu0 %vm3481_vm2, %v3480_v22 }
 0x2c7   :  { %3053 = vmatprep.subr.bf16.mxu0 %v3480_v22 }
 0x2cd   :  { %3044 = vmatmul.mubr.msk.bf16.vlgmr.msra.gmra.mrb[16].mxu0 %vm223_vm3, %v554_v16 }
 0x2ce   :  { %3057 = vmatprep.mubr.msk.bf16.mxu0 %vm3481_vm2, %v3480_v22 }
 0x369   :  { %v264_v18 = vpop.f32.mrb[4].mxu0 }
 0x36a   :  { %v3009_v19 = vpop.f32.mrb[5].mxu0  ;;  %v271_v23 = vsel %vm270_vm4, %v264_v18, -inf }
 0x36b   :  { %272 = vmax.xlane.f32.xlu0 %v271_v23  ;;  %v267_v25 = vpop.f32.mrb[6].mxu0 }
 0x36c   :  { %v3010_v26 = vpop.f32.mrb[7].mxu0 }
 0x390   :  { %v377_v27 = vpop.f32.mrb[8].mxu0 }
 0x391   :  { %v3021_v28 = vpop.f32.mrb[9].mxu0  ;;  %v383_v29 = vsel %vm270_vm4, %v377_v27, -inf }
 0x392   :  { %384 = vmax.xlane.f32.xlu1 %v383_v29  ;;  %v380_v30 = vpop.f32.mrb[10].mxu0 }
 0x393   :  { %v3022_v31 = vpop.f32.mrb[11].mxu0 }
 0x398   :  { %v487_v32 = vpop.f32.mrb[12].mxu0 }
 0x399   :  { %v3033_v33 = vpop.f32.mrb[13].mxu0  ;;  %v493_v34 = vsel %vm270_vm4, %v487_v32, -inf }
 0x39a   :  { %494 = vmax.xlane.f32.xlu0 %v493_v34  ;;  %v490_v35 = vpop.f32.mrb[14].mxu0 }
 0x39b   :  { %v3034_v36 = vpop.f32.mrb[15].mxu0 }
 0x3a0   :  { %v597_v38 = vpop.f32.mrb[16].mxu0 }
 0x3a1   :  { %v3045_v39 = vpop.f32.mrb[17].mxu0  ;;  %v603_v40 = vsel %vm270_vm4, %v597_v38, -inf }
 0x3a2   :  { %604 = vmax.xlane.f32.xlu0 %v603_v40  ;;  %v600_v41 = vpop.f32.mrb[18].mxu0 }
 0x3a3   :  { %v3046_v45 = vpop.f32.mrb[19].mxu0 }
 0x3f8   :  { %v273_v46 = vpop.xlane.xlu0 %272 }
 0x3f9   :  { %v274_v47 = vsub.f32 %v264_v18, %v273_v46 }
 0x3fb   :  { %v275_v48 = vmul.f32 1.442695, %v274_v47 }
 0x3fd   :  { %3349 = vpow2.f32 %v275_v48 }
 0x407   :  { %v3350_v49 = vpop.eup %3349 }
 0x408   :  { %v277_v50 = vsel %vm270_vm4, %v3350_v49, 0.0 }
 0x409   :  { %278 = vadd.xlane.f32.xlu0 %v277_v50 }
 0x41f   :  { %v385_v52 = vpop.xlane.xlu1 %384 }
 0x420   :  { %v386_v54 = vsub.f32 %v377_v27, %v385_v52 }
 0x422   :  { %v387_v55 = vmul.f32 1.442695, %v386_v54 }
 0x424   :  { %3351 = vpow2.f32 %v387_v55 }
 0x427   :  { %v495_v57 = vpop.xlane.xlu0 %494 }
 0x428   :  { %v496_v58 = vsub.f32 %v487_v32, %v495_v57 }
 0x42a   :  { %v497_v59 = vmul.f32 1.442695, %v496_v58 }
 0x42c   :  { %3353 = vpow2.f32 %v497_v59 }
 0x42e   :  { %v3352_v60 = vpop.eup %3351 }
 0x42f   :  { %v389_v61 = vsel %vm270_vm4, %v3352_v60, 0.0  ;;  %v605_v1 = vpop.xlane.xlu0 %604 }
 0x430   :  { %390 = vadd.xlane.f32.xlu1 %v389_v61  ;;  %v606_v2 = vsub.f32 %v597_v38, %v605_v1 }
 0x432   :  { %v607_v3 = vmul.f32 1.442695, %v606_v2 }
 0x434   :  { %3355 = vpow2.f32 %v607_v3 }
 0x436   :  { %v3354_v62 = vpop.eup %3353 }
 0x437   :  { %v499_v0 = vsel %vm270_vm4, %v3354_v62, 0.0 }
 0x438   :  { %500 = vadd.xlane.f32.xlu0 %v499_v0 }
 0x43e   :  { %v3356_v5 = vpop.eup %3355 }
 0x43f   :  { %v609_v6 = vsel %vm270_vm4, %v3356_v5, 0.0 }
 0x441   :  { %395 = vrot.lane.b32.xlu1 %v3611_v63, %s3489_s10 }
 0x445   :  { %505 = vrot.lane.b32.xlu1 %v3611_v63, %s3490_s11 }
 0x44e   :  { %283 = vrot.lane.b32.xlu0 %v3611_v63, %s3479_s24 }
 0x452   :  { %749 = vrot.lane.b32.xlu0 %v3622_v4, %s3482_s29 }
 0x456   :  { %872 = vrot.lane.b32.xlu0 %v3611_v63, %s3486_s7 }
 0x45a   :  { %995 = vrot.lane.b32.xlu0 %v3611_v63, %s3487_s8 }
 0x45e   :  { %1118 = vrot.lane.b32.xlu0 %v3611_v63, %s3488_s9 }
 0x469   :  { %610 = vadd.xlane.f32.xlu1 %v609_v6 }
 0x47a   :  { %615 = vrot.lane.b32.xlu1 %v3611_v63, %s3491_s12 }
 0x47e   :  { %874 = vrot.lane.b32.xlu1 %v3622_v4, %s3483_s30 }
 0x482   :  { %997 = vrot.lane.b32.xlu1 %v3622_v4, %s3484_s5 }
 0x486   :  { %1120 = vrot.lane.b32.xlu1 %v3622_v4, %s3485_s6 }
 0x496   :  { %v279_v7 = vpop.xlane.xlu0 %278 }
 0x497   :  { %3357 = vrcp.f32 %v279_v7 }
 0x4a1   :  { %v3358_v9 = vpop.eup %3357 }
 0x4a2   :  { %v281_v11 = vmul.f32 %v3358_v9, %v3350_v49 }
 0x4a4   :  { %v282_v15 = vpack.c.bf16 %v281_v11, %v281_v11 }
 0x4bd   :  { %v391_v8 = vpop.xlane.xlu1 %390 }
 0x4be   :  { %3359 = vrcp.f32 %v391_v8 }
 0x4c1   :  { %v396_v14 = vpop.permute.xlu1 %395 }
 0x4c2   :  { %v401_v18 = vsel %vm288_vm5, %v396_v14, 0 }
 0x4c5   :  { %v501_v10 = vpop.xlane.xlu0 %500  ;;  %v506_v23 = vpop.permute.xlu1 %505 }
 0x4c6   :  { %3361 = vrcp.f32 %v501_v10  ;;  %v511_v27 = vsel %vm288_vm5, %v506_v23, 0 }
 0x4c8   :  { %v3360_v16 = vpop.eup %3359 }
 0x4c9   :  { %v284_v12 = vpop.permute.xlu0 %283  ;;  %v393_v19 = vmul.f32 %v3360_v16, %v3352_v60 }
 0x4ca   :  { %v290_v13 = vsel %vm288_vm5, %v284_v12, 0 }
 0x4cb   :  { %3012 = vmatpush3.bf16.msra.mxu1 %v290_v13  ;;  %v394_v25 = vpack.c.bf16 %v393_v19, %v393_v19 }
 0x4cc   :  { %3023 = vmatprep.subr.bf16.mxu1 %v3480_v22 }
 0x4cd   :  { %v750_v35 = vpop.permute.xlu0 %749 }
 0x4ce   :  { %3014 = vmatmul.mubr.msk.bf16.vlgmr.msra.gmra.mrb[4].mxu1 %vm270_vm4, %v282_v15  ;;  %v755_v38 = vsel %vm223_vm3, %v750_v35, 0 }
 0x4cf   :  { %3024 = vmatpush3.bf16.msra.mxu1 %v401_v18  ;;  %3025 = vmatprep.mubr.msk.bf16.mxu1 %vm3481_vm2, %v3480_v22 }
 0x4d0   :  { %3035 = vmatprep.subr.bf16.mxu1 %v3480_v22  ;;  %v3362_v26 = vpop.eup %3361 }
 0x4d1   :  { %v503_v28 = vmul.f32 %v3362_v26, %v3354_v62  ;;  %v873_v45 = vpop.permute.xlu0 %872 }
 0x4d3   :  { %v504_v29 = vpack.c.bf16 %v503_v28, %v503_v28 }
 0x4d6   :  { %3026 = vmatmul.mubr.msk.bf16.vlgmr.msra.gmra.mrb[8].mxu1 %vm270_vm4, %v394_v25 }
 0x4d7   :  { %3036 = vmatpush3.bf16.msra.mxu1 %v511_v27  ;;  %3037 = vmatprep.mubr.msk.bf16.mxu1 %vm3481_vm2, %v3480_v22 }
 0x4d8   :  { %3047 = vmatprep.subr.bf16.mxu1 %v3480_v22 }
 0x4de   :  { %3038 = vmatmul.mubr.msk.bf16.vlgmr.msra.gmra.mrb[12].mxu1 %vm270_vm4, %v504_v29 }
 0x4df   :  { %3049 = vmatprep.mubr.msk.bf16.mxu1 %vm3481_vm2, %v3480_v22 }
 0x4f6   :  { %v611_v30 = vpop.xlane.xlu1 %610 }
 0x4f7   :  { %3363 = vrcp.f32 %v611_v30 }
 0x4fa   :  { %v616_v31 = vpop.permute.xlu1 %615 }
 0x4fb   :  { %v621_v32 = vsel %vm288_vm5, %v616_v31, 0 }
 0x4fc   :  { %3048 = vmatpush3.bf16.msra.mxu1 %v621_v32 }
 0x4fd   :  { %3061 = vmatprep.subr.bf16.mxu1 %v3480_v22 }
 0x4fe   :  { %v875_v39 = vpop.permute.xlu1 %874 }
 0x4ff   :  { %v880_v40 = vsel %vm223_vm3, %v875_v39, 0 }
 0x501   :  { %v3364_v33 = vpop.eup %3363 }
 0x502   :  { %v613_v34 = vmul.f32 %v3364_v33, %v3356_v5  ;;  %v998_v41 = vpop.permute.xlu1 %997 }
 0x503   :  { %v1003_v46 = vsel %vm223_vm3, %v998_v41, 0 }
 0x504   :  { %v614_v36 = vpack.c.bf16 %v613_v34, %v613_v34 }
 0x506   :  { %3050 = vmatmul.mubr.msk.bf16.vlgmr.msra.gmra.mrb[16].mxu1 %vm270_vm4, %v614_v36  ;;  %v1121_v47 = vpop.permute.xlu1 %1120  ;;  %v3739_v36 = vld [vmem:[%s4215_s3 + $0x10] sm:$0xff]  }
 0x507   :  { %3062 = vmatpush3.bf16.xpose.msra.mxu1 %v755_v38  ;;  %3063 = vmatprep.mubr.msk.bf16.mxu1 %vm3481_vm2, %v3480_v22  ;;  %v1126_v48 = vsel %vm223_vm3, %v1121_v47, 0  ;;  %v3749_v38 = vld [vmem:[%s4215_s3 + $0x18] sm:$0xff]  }
 0x508   :  { %3073 = vmatprep.subr.bf16.mxu1 %v3480_v22  ;;  %3054 = vmatpush3.bf16.msra.mxu0 %v3739_v36 }
 0x509   :  { %3055 = vmatprep.subr.bf16.mxu0 %v3480_v22 }
 0x50c   :  { %3056 = vmatpush3.bf16.msra.mxu0 %v3749_v38 }
 0x50d   :  { %3067 = vmatprep.subr.bf16.mxu0 %v3480_v22 }
 0x50e   :  { %3064 = vmatmul.mubr.msk.bf16.vlgmr.msra.gmra.mrb[20].mxu1 %vm223_vm3, %v3611_v63  ;;  %v996_v63 = vpop.permute.xlu0 %995 }
 0x50f   :  { %3074 = vmatpush3.bf16.xpose.msra.mxu1 %v880_v40  ;;  %3075 = vmatprep.mubr.msk.bf16.mxu1 %vm3481_vm2, %v3480_v22 }
 0x510   :  { %3085 = vmatprep.subr.bf16.mxu1 %v3480_v22 }
 0x512   :  { %v1119_v49 = vpop.permute.xlu0 %1118 }
 0x516   :  { %3076 = vmatmul.mubr.msk.bf16.vlgmr.msra.gmra.mrb[24].mxu1 %vm223_vm3, %v873_v45 }
 0x517   :  { %3086 = vmatpush3.bf16.xpose.msra.mxu1 %v1003_v46  ;;  %3087 = vmatprep.mubr.msk.bf16.mxu1 %vm3481_vm2, %v3480_v22 }
 0x518   :  { %3097 = vmatprep.subr.bf16.mxu1 %v3480_v22 }
 0x51e   :  { %3088 = vmatmul.mubr.msk.bf16.vlgmr.msra.gmra.mrb[28].mxu1 %vm223_vm3, %v996_v63 }
 0x51f   :  { %3098 = vmatpush3.bf16.xpose.msra.mxu1 %v1126_v48  ;;  %3099 = vmatprep.mubr.msk.bf16.mxu1 %vm3481_vm2, %v3480_v22 }
 0x520   :  { %3109 = vmatprep.subr.bf16.mxu1 %v3480_v22 }
 0x526   :  { %3100 = vmatmul.mubr.msk.bf16.vlgmr.msra.gmra.mrb[32].mxu1 %vm223_vm3, %v1119_v49 }
 0x527   :  { %3113 = vmatprep.mubr.msk.bf16.mxu1 %vm3481_vm2, %v3480_v22  ;;  %3110 = vmatpush3.bf16.msra.mxu1 %v3739_v36 }
 0x528   :  { %3111 = vmatprep.subr.bf16.mxu1 %v3480_v22 }
 0x52b   :  { %3112 = vmatpush3.bf16.msra.mxu1 %v3749_v38 }
 0x52c   :  { %3125 = vmatprep.subr.bf16.mxu1 %v3480_v22 }
 0x5a1   :  { %v3722_v50 = vpop.f32.mrb[4].mxu1 }
 0x5a2   :  { %v3015_v52 = vpop.f32.mrb[5].mxu1 }
 0x5a3   :  { %v329_v54 = vpop.f32.mrb[6].mxu1 }
 0x5a4   :  { %v3016_v55 = vpop.f32.mrb[7].mxu1 }
 0x5a9   :  { %v437_v57 = vpop.f32.mrb[8].mxu1 }
 0x5aa   :  { %v3027_v58 = vpop.f32.mrb[9].mxu1 }
 0x5ab   :  { %v440_v59 = vpop.f32.mrb[10].mxu1 }
 0x5ac   :  { %v3028_v60 = vpop.f32.mrb[11].mxu1 }
 0x5b1   :  { %v547_v61 = vpop.f32.mrb[12].mxu1 }
 0x5b2   :  { %v3039_v62 = vpop.f32.mrb[13].mxu1 }
 0x5b3   :  { %v550_v0 = vpop.f32.mrb[14].mxu1 }
 0x5b4   :  { %v3040_v1 = vpop.f32.mrb[15].mxu1 }
 0x5d9   :  { %v657_v2 = vpop.f32.mrb[16].mxu1 }
 0x5da   :  { %v3051_v3 = vpop.f32.mrb[17].mxu1 }
 0x5db   :  { %v660_v5 = vpop.f32.mrb[18].mxu1 }
 0x5dc   :  { %v3052_v6 = vpop.f32.mrb[19].mxu1 }
 0x5e1   :  { %v791_v7 = vpop.f32.mrb[20].mxu1 }
 0x5e2   :  { %v3065_v8 = vpop.f32.mrb[21].mxu1  ;;  %v798_v9 = vsel %vm223_vm3, %v791_v7, -inf }
 0x5e3   :  { %799 = vmax.xlane.f32.xlu1 %v798_v9  ;;  %v794_v10 = vpop.f32.mrb[22].mxu1 }
 0x5e4   :  { %v3066_v11 = vpop.f32.mrb[23].mxu1  ;;  %v802_v12 = vsel %vm801_vm6, %v794_v10, -inf }
 0x5e5   :  { %803 = vmax.xlane.f32.xlu0 %v802_v12 }
 0x5e9   :  { %v916_v13 = vpop.f32.mrb[24].mxu1 }
 0x5ea   :  { %v3077_v14 = vpop.f32.mrb[25].mxu1  ;;  %v923_v15 = vsel %vm223_vm3, %v916_v13, -inf }
 0x5eb   :  { %924 = vmax.xlane.f32.xlu0 %v923_v15  ;;  %v919_v16 = vpop.f32.mrb[26].mxu1 }
 0x5ec   :  { %v3078_v18 = vpop.f32.mrb[27].mxu1  ;;  %v926_v19 = vsel %vm801_vm6, %v919_v16, -inf }
 0x5ef   :  { %927 = vmax.xlane.f32.xlu0 %v926_v19 }
 0x5f1   :  { %v1039_v23 = vpop.f32.mrb[28].mxu1 }
 0x5f2   :  { %v3089_v25 = vpop.f32.mrb[29].mxu1  ;;  %v1046_v26 = vsel %vm223_vm3, %v1039_v23, -inf }
 0x5f3   :  { %1047 = vmax.xlane.f32.xlu1 %v1046_v26  ;;  %v1042_v27 = vpop.f32.mrb[30].mxu1 }
 0x5f4   :  { %v3090_v28 = vpop.f32.mrb[31].mxu1  ;;  %v1049_v29 = vsel %vm801_vm6, %v1042_v27, -inf }
 0x5f5   :  { %1050 = vmax.xlane.f32.xlu0 %v1049_v29 }
 0x5f9   :  { %v1162_v30 = vpop.f32.mrb[32].mxu1 }
 0x5fa   :  { %v3101_v31 = vpop.f32.mrb[33].mxu1  ;;  %v1169_v32 = vsel %vm223_vm3, %v1162_v30, -inf }
 0x5fb   :  { %1170 = vmax.xlane.f32.xlu1 %v1169_v32  ;;  %v3731_v33 = vpop.f32.mrb[34].mxu1 }
 0x5fc   :  { %v3102_v34 = vpop.f32.mrb[35].mxu1  ;;  %v1172_v35 = vsel %vm801_vm6, %v3731_v33, -inf }
 0x5fd   :  { %1173 = vmax.xlane.f32.xlu0 %v1172_v35 }
 0x60c   :  { %664 = vrot.lane.b32.xlu1 %v437_v57, %s3492_s13 }
 0x610   :  { %672 = vrot.lane.b32.xlu1 %v657_v2, %s3493_s16 }
 0x613   :  { %668 = vrot.lane.b32.xlu0 %v547_v61, %s3494_s19 }
 0x614   :  { %822 = vrot.lane.b32.xlu1 %v3622_v4, %s3479_s24 }
 0x670   :  { %v800_v39 = vpop.xlane.xlu1 %799 }
 0x671   :  { %v805_v40 = vsub.f32 %v791_v7, %v800_v39  ;;  %v3809_v39 = vld [vmem:[%s4213_s1 + $0x18] sm:$0xf] }
 0x672   :  { %v804_v41 = vpop.xlane.xlu0 %803 }
 0x673   :  { %v807_v45 = vmul.f32 1.442695, %v805_v40  ;;  %v806_v46 = vsub.f32 %v794_v10, %v804_v41  ;;  %v3814_v40 = vld [vmem:[%s4213_s1 + $0x10] sm:$0xff]  ;;  %v1352_v41 = vsel %vm79_vm1, %v3809_v39, 0.0 }
 0x675   :  { %3365 = vpow2.f32 %v807_v45  ;;  %v809_v47 = vmul.f32 1.442695, %v806_v46  ;;  %v3821_v45 = vld [vmem:[%s4212_s0 + $0x8] sm:$0xff] }
 0x676   :  { %v1331_v46 = vsel %vm49_vm0, %v3821_v45, 0.0 }
 0x677   :  { %3367 = vpow2.f32 %v809_v47 }
 0x678   :  { %v925_v63 = vpop.xlane.xlu0 %924 }
 0x679   :  { %v929_v48 = vsub.f32 %v916_v13, %v925_v63 }
 0x67b   :  { %v931_v49 = vmul.f32 1.442695, %v929_v48 }
 0x67c   :  { %v928_v52 = vpop.xlane.xlu0 %927 }
 0x67d   :  { %3369 = vpow2.f32 %v931_v49  ;;  %v930_v54 = vsub.f32 %v919_v16, %v928_v52 }
 0x67f   :  { %v3758_v55 = vpop.eup %3365  ;;  %v933_v57 = vmul.f32 1.442695, %v930_v54 }
 0x680   :  { %v1048_v58 = vpop.xlane.xlu1 %1047  ;;  %v811_v59 = vsel %vm223_vm3, %v3758_v55, 0.0 }
 0x681   :  { %v3762_v60 = vpop.eup %3367  ;;  %3371 = vpow2.f32 %v933_v57  ;;  %v1052_v61 = vsub.f32 %v1039_v23, %v1048_v58  ;;  %812 = vadd.xlane.f32.xlu1 %v811_v59 }
 0x682   :  { %v1051_v62 = vpop.xlane.xlu0 %1050  ;;  %v814_v0 = vsel %vm801_vm6, %v3762_v60, 0.0 }
 0x683   :  { %v1054_v1 = vmul.f32 1.442695, %v1052_v61  ;;  %v1053_v2 = vsub.f32 %v1042_v27, %v1051_v62  ;;  %815 = vadd.xlane.f32.xlu0 %v814_v0 }
 0x685   :  { %3373 = vpow2.f32 %v1054_v1  ;;  %v1056_v3 = vmul.f32 1.442695, %v1053_v2 }
 0x687   :  { %v3766_v5 = vpop.eup %3369  ;;  %3375 = vpow2.f32 %v1056_v3 }
 0x688   :  { %v1171_v6 = vpop.xlane.xlu1 %1170  ;;  %v935_v7 = vsel %vm223_vm3, %v3766_v5, 0.0 }
 0x689   :  { %v1175_v8 = vsub.f32 %v1162_v30, %v1171_v6  ;;  %936 = vadd.xlane.f32.xlu1 %v935_v7 }
 0x68a   :  { %v1174_v9 = vpop.xlane.xlu0 %1173 }
 0x68b   :  { %v3770_v10 = vpop.eup %3371  ;;  %v1177_v11 = vmul.f32 1.442695, %v1175_v8  ;;  %v1176_v12 = vsub.f32 %v3731_v33, %v1174_v9 }
 0x68c   :  { %v665_v13 = vpop.permute.xlu1 %664  ;;  %v938_v14 = vsel %vm801_vm6, %v3770_v10, 0.0 }
 0x68d   :  { %3377 = vpow2.f32 %v1177_v11  ;;  %v1179_v15 = vmul.f32 1.442695, %v1176_v12  ;;  %v675_v16 = vsel %vm223_vm3, %v3722_v50, %v665_v13  ;;  %939 = vadd.xlane.f32.xlu0 %v938_v14 }
 0x68e   :  { %v669_v18 = vpop.permute.xlu0 %668 }
 0x68f   :  { %v3777_v19 = vpop.eup %3373  ;;  %3379 = vpow2.f32 %v1179_v15  ;;  %v677_v23 = vsel %vm676_vm7, %v675_v16, %v669_v18 }
 0x690   :  { %v673_v25 = vpop.permute.xlu1 %672  ;;  %v1058_v26 = vsel %vm223_vm3, %v3777_v19, 0.0 }
 0x691   :  { %v3782_v27 = vpop.eup %3375  ;;  %v679_v28 = vsel %vm678_vm8, %v677_v23, %v673_v25  ;;  %1059 = vadd.xlane.f32.xlu0 %v1058_v26 }
 0x692   :  { %v680_v29 = vpack.c.bf16 %v679_v28, %v679_v28  ;;  %v1061_v30 = vsel %vm801_vm6, %v3782_v27, 0.0 }
 0x694   :  { %v823_v50 = vpop.permute.xlu1 %822  ;;  %3058 = vmatmul.mubr.msk.bf16.vlgmr.msra.gmra.mrb[20].mxu0 %vm49_vm0, %v680_v29 }
 0x695   :  { %v829_v31 = vsel %vm827_vm9, %v823_v50, 0  ;;  %1062 = vadd.xlane.f32.xlu0 %v1061_v30  ;;  %3069 = vmatprep.mubr.msk.bf16.mxu0 %vm3481_vm2, %v3480_v22 }
 0x696   :  { %3068 = vmatpush3.bf16.msra.mxu0 %v829_v31 }
 0x697   :  { %v3791_v32 = vpop.eup %3377  ;;  %3079 = vmatprep.subr.bf16.mxu0 %v3480_v22 }
 0x698   :  { %v1181_v33 = vsel %vm223_vm3, %v3791_v32, 0.0 }
 0x699   :  { %v3796_v34 = vpop.eup %3379  ;;  %1182 = vadd.xlane.f32.xlu1 %v1181_v33 }
 0x69a   :  { %v1184_v35 = vsel %vm801_vm6, %v3796_v34, 0.0 }
 0x69b   :  { %1185 = vadd.xlane.f32.xlu0 %v1184_v35 }
 0x6aa   :  { %1069 = vrot.lane.b32.xlu1 %v3622_v4, %s3490_s11 }
 0x6ae   :  { %1192 = vrot.lane.b32.xlu1 %v3622_v4, %s3491_s12 }
 0x6b1   :  { %946 = vrot.lane.b32.xlu0 %v3622_v4, %s3489_s10  ;;  %v1349_v4 = vsel %vm49_vm0, %v3814_v40, 0.0 }
 0x6d0   :  { %1353 = vadd.xlane.f32.xlu0 %v1352_v41 }
 0x6d2   :  { %1350 = vadd.xlane.f32.xlu1 %v1349_v4 }
 0x6d4   :  { %1332 = vadd.xlane.f32.xlu0 %v1331_v46 }
 0x70e   :  { %v813_v47 = vpop.xlane.xlu1 %812 }
 0x70f   :  { %3381 = vrcp.f32 %v813_v47 }
 0x710   :  { %v816_v63 = vpop.xlane.xlu0 %815 }
 0x711   :  { %3383 = vrcp.f32 %v816_v63 }
 0x716   :  { %v937_v58 = vpop.xlane.xlu1 %936 }
 0x719   :  { %v3382_v48 = vpop.eup %3381 }
 0x71a   :  { %v940_v49 = vpop.xlane.xlu0 %939  ;;  %v819_v54 = vmul.f32 %v3382_v48, %v3758_v55 }
 0x71b   :  { %v3384_v52 = vpop.eup %3383  ;;  %3385 = vrcp.f32 %v940_v49 }
 0x71c   :  { %v820_v57 = vmul.f32 %v3384_v52, %v3762_v60  ;;  %3387 = vrcp.f32 %v937_v58 }
 0x71e   :  { %v1060_v59 = vpop.xlane.xlu0 %1059  ;;  %v821_v61 = vpack.c.bf16 %v820_v57, %v819_v54 }
 0x720   :  { %3070 = vmatmul.mubr.msk.bf16.vlgmr.msra.gmra.mrb[24].mxu0 %vm223_vm3, %v821_v61 }
 0x721   :  { %3081 = vmatprep.mubr.msk.bf16.mxu0 %vm3481_vm2, %v3480_v22 }
 0x722   :  { %v1063_v62 = vpop.xlane.xlu0 %1062 }
 0x723   :  { %3389 = vrcp.f32 %v1063_v62 }
 0x724   :  { %3391 = vrcp.f32 %v1060_v59 }
 0x725   :  { %v3386_v0 = vpop.eup %3385 }
 0x726   :  { %v1183_v1 = vpop.xlane.xlu1 %1182  ;;  %v3388_v3 = vpop.eup %3387  ;;  %v944_v55 = vmul.f32 %v3386_v0, %v3770_v10 }
 0x727   :  { %v943_v6 = vmul.f32 %v3388_v3, %v3766_v5 }
 0x728   :  { %v1186_v2 = vpop.xlane.xlu0 %1185 }
 0x729   :  { %3393 = vrcp.f32 %v1186_v2  ;;  %v945_v9 = vpack.c.bf16 %v944_v55, %v943_v6 }
 0x72a   :  { %v1070_v8 = vpop.permute.xlu1 %1069  ;;  %3395 = vrcp.f32 %v1183_v1 }
 0x72b   :  { %v1075_v12 = vsel %vm827_vm9, %v1070_v8, 0 }
 0x72c   :  { %v947_v60 = vpop.permute.xlu0 %946 }
 0x72d   :  { %v952_v7 = vsel %vm827_vm9, %v947_v60, 0  ;;  %v3390_v11 = vpop.eup %3389 }
 0x72e   :  { %3080 = vmatpush3.bf16.msra.mxu0 %v952_v7  ;;  %v3392_v13 = vpop.eup %3391  ;;  %v1067_v5 = vmul.f32 %v3390_v11, %v3782_v27  ;;  %v1193_v14 = vpop.permute.xlu1 %1192 }
 0x72f   :  { %3091 = vmatprep.subr.bf16.mxu0 %v3480_v22  ;;  %v1066_v10 = vmul.f32 %v3392_v13, %v3777_v19  ;;  %v1198_v18 = vsel %vm827_vm9, %v1193_v14, 0 }
 0x731   :  { %3082 = vmatmul.mubr.msk.bf16.vlgmr.msra.gmra.mrb[28].mxu0 %vm223_vm3, %v945_v9  ;;  %v1068_v15 = vpack.c.bf16 %v1067_v5, %v1066_v10 }
 0x732   :  { %3092 = vmatpush3.bf16.msra.mxu0 %v1075_v12  ;;  %3093 = vmatprep.mubr.msk.bf16.mxu0 %vm3481_vm2, %v3480_v22 }
 0x733   :  { %3103 = vmatprep.subr.bf16.mxu0 %v3480_v22  ;;  %v3394_v16 = vpop.eup %3393 }
 0x734   :  { %v3396_v23 = vpop.eup %3395  ;;  %v1190_v25 = vmul.f32 %v3394_v16, %v3796_v34 }
 0x735   :  { %v1189_v26 = vmul.f32 %v3396_v23, %v3791_v32 }
 0x737   :  { %v1191_v27 = vpack.c.bf16 %v1190_v25, %v1189_v26 }
 0x739   :  { %3094 = vmatmul.mubr.msk.bf16.vlgmr.msra.gmra.mrb[32].mxu0 %vm223_vm3, %v1068_v15 }
 0x73a   :  { %3104 = vmatpush3.bf16.msra.mxu0 %v1198_v18  ;;  %3105 = vmatprep.mubr.msk.bf16.mxu0 %vm3481_vm2, %v3480_v22 }
 0x73b   :  { %3117 = vmatprep.subr.bf16.mxu0 %v3480_v22 }
 0x741   :  { %3106 = vmatmul.mubr.msk.bf16.vlgmr.msra.gmra.mrb[36].mxu0 %vm223_vm3, %v1191_v27 }
 0x742   :  { %3118 = vmatpush3.bf16.msra.mxu0 %v3553_v21  ;;  %3121 = vmatprep.mubr.msk.bf16.mxu0 %vm3481_vm2, %v3480_v22 }
 0x743   :  { %3119 = vmatprep.subr.bf16.mxu0 %v3480_v22 }
 0x746   :  { %3120 = vmatpush3.bf16.msra.mxu0 %v3563_v24 }
 0x747   :  { %3133 = vmatprep.subr.bf16.mxu0 %v3480_v22 }
 0x75d   :  { %v1354_v19 = vpop.xlane.xlu0 %1353 }
 0x75e   :  { %v1356_v28 = vmul.f32 0.03125, %v1354_v19 }
 0x75f   :  { %v1351_v29 = vpop.xlane.xlu1 %1350 }
 0x760   :  { %v3858_v50 = vsub.f32 %v3809_v39, %v1356_v28  ;;  %v1355_v30 = vmul.f32 0.03125, %v1351_v29 }
 0x761   :  { %v1333_v31 = vpop.xlane.xlu0 %1332 }
 0x762   :  { %v3861_v32 = vsub.f32 %v3814_v40, %v1355_v30  ;;  %v1334_v21 = vmul.f32 0.03125, %v1333_v31  ;;  %v1360_v33 = vmul.f32 %v3858_v50, %v3858_v50 }
 0x764   :  { %v1335_v34 = vsub.f32 %v3821_v45, %v1334_v21  ;;  %v1364_v24 = vsel %vm79_vm1, %v1360_v33, 0.0  ;;  %v1359_v35 = vmul.f32 %v3861_v32, %v3861_v32 }
 0x765   :  { %1365 = vadd.xlane.f32.xlu0 %v1364_v24 }
 0x766   :  { %v1361_v39 = vsel %vm49_vm0, %v1359_v35, 0.0  ;;  %v1336_v41 = vmul.f32 %v1335_v34, %v1335_v34 }
 0x767   :  { %1362 = vadd.xlane.f32.xlu1 %v1361_v39  ;;  %v3870_v4 = vpop.f32.mrb[20].mxu0 }
 0x768   :  { %v3059_v40 = vpop.f32.mrb[21].mxu0  ;;  %v1337_v46 = vsel %vm49_vm0, %v1336_v41, 0.0 }
 0x769   :  { %v737_v47 = vpop.f32.mrb[22].mxu0 }
 0x76a   :  { %v3060_v63 = vpop.f32.mrb[23].mxu0 }
 0x76b   :  { %1338 = vadd.xlane.f32.xlu1 %v1337_v46 }
 0x7f2   :  { %v1366_v15 = vpop.xlane.xlu0 %1365 }
 0x7f3   :  { %v865_v48 = vpop.f32.mrb[24].mxu0  ;;  %v1368_v18 = vmul.f32 0.03125, %v1366_v15 }
 0x7f4   :  { %v1363_v45 = vpop.xlane.xlu1 %1362  ;;  %v3071_v49 = vpop.f32.mrb[25].mxu0 }
 0x7f5   :  { %v868_v52 = vpop.f32.mrb[26].mxu0  ;;  %v1367_v16 = vmul.f32 0.03125, %v1363_v45  ;;  %v1370_v25 = vadd.f32 1e-05, %v1368_v18 }
 0x7f6   :  { %v3072_v54 = vpop.f32.mrb[27].mxu0 }
 0x7f7   :  { %v1369_v23 = vadd.f32 1e-05, %v1367_v16 }
 0x7f8   :  { %v1339_v57 = vpop.xlane.xlu1 %1338 }
 0x7f9   :  { %v1340_v58 = vmul.f32 0.03125, %v1339_v57 }
 0x7fb   :  { %v1341_v59 = vadd.f32 1e-05, %v1340_v58 }
 0x7fd   :  { %3397 = vrsqrt.f32 %v1341_v59 }
 0x7fe   :  { %3399 = vrsqrt.f32 %v1369_v23 }
 0x7ff   :  { %3401 = vrsqrt.f32 %v1370_v25 }
 0x804   :  { %v988_v61 = vpop.f32.mrb[28].mxu0 }
 0x805   :  { %v3083_v62 = vpop.f32.mrb[29].mxu0 }
 0x806   :  { %v991_v0 = vpop.f32.mrb[30].mxu0 }
 0x807   :  { %v3398_v1 = vpop.eup %3397  ;;  %v3299_v2 = vpack.i.bf16 %v991_v0, %v988_v61  ;;  %v3084_v3 = vpop.f32.mrb[31].mxu0 }
 0x808   :  { %v1343_v55 = vmul.f32 %v3398_v1, %v1335_v34  ;;  %v3400_v19 = vpop.eup %3399 }
 0x809   :  { %3300 = vrot.lane.b32.xlu0 %v3299_v2, %s3492_s13  ;;  %v3402_v21 = vpop.eup %3401  ;;  %v1373_v33 = vmul.f32 %v3400_v19, %v3861_v32 }
 0x80a   :  { %v1344_v60 = vmul.f32 %v1343_v55, %v3544_v20  ;;  %v1374_v40 = vmul.f32 %v3402_v21, %v3858_v50 }
 0x80b   :  { %v1375_v49 = vmul.f32 %v1373_v33, %v3577_v37 }
 0x80c   :  { %v1111_v6 = vpop.f32.mrb[32].mxu0  ;;  %v3876_v7 = vadd.f32 %v1344_v60, %v3594_v51  ;;  %v1376_v54 = vmul.f32 %v1374_v40, %v3577_v37  ;;  %v3452_v37 = vld [vmem:[%s4215_s3 + $0x8] sm:$0xff]  }
 0x80d   :  { %v3095_v8 = vpop.f32.mrb[33].mxu0  ;;  %v3903_v50 = vadd.f32 %v1375_v49, %v3581_v42 }
 0x80e   :  { %v1114_v9 = vpop.f32.mrb[34].mxu0  ;;  %v1379_v11 = vpack.c.bf16 %v3876_v7, %v3876_v7 }
 0x80f   :  { %v3304_v12 = vpack.i.bf16 %v1114_v9, %v1111_v6  ;;  %v3096_v13 = vpop.f32.mrb[35].mxu0 }
 0x810   :  { %3122 = vmatmul.mubr.msk.bf16.vlgmr.msra.gmra.mrb[40].mxu0 %vm49_vm0, %v1379_v11 }
 0x811   :  { %3305 = vrot.lane.b32.xlu1 %v3304_v12, %s3494_s19  ;;  %3135 = vmatprep.mubr.msk.bf16.mxu0 %vm3481_vm2, %v3480_v22 }
 0x814   :  { %v1234_v5 = vpop.f32.mrb[36].mxu0 }
 0x815   :  { %v3107_v20 = vpop.f32.mrb[37].mxu0 }
 0x816   :  { %v1237_v10 = vpop.f32.mrb[38].mxu0 }
 0x817   :  { %v3309_v14 = vpack.i.bf16 %v1237_v10, %v1234_v5  ;;  %v3108_v51 = vpop.f32.mrb[39].mxu0 }
 0x819   :  { %3310 = vrot.lane.b32.xlu1 %v3309_v14, %s3493_s16 }
 0x87b   :  { %v3301_v26 = vpop.permute.xlu0 %3300 }
 0x87c   :  { %v3303_v28 = vunpack.i.h.bf16 %v3301_v26  ;;  %v3302_v29 = vunpack.i.l.bf16 %v3301_v26 }
 0x87e   :  { %v1266_v24 = vsel %vm223_vm3, %v868_v52, %v3303_v28  ;;  %v1265_v35 = vsel %vm223_vm3, %v865_v48, %v3302_v29  ;;  %v3451_v48 = vld [vmem:[%s4215_s3] sm:$0xff]   ;;  %v3906_v52 = vadd.f32 %v1376_v54, %v3581_v42 }
 0x880   :  { %v1424_v57 = vpack.c.bf16 %v3906_v52, %v3903_v50 }
 0x883   :  { %v3306_v27 = vpop.permute.xlu1 %3305 }
 0x884   :  { %v3308_v30 = vunpack.i.h.bf16 %v3306_v27  ;;  %v3307_v31 = vunpack.i.l.bf16 %v3306_v27 }
 0x886   :  { %v1267_v46 = vsel %vm676_vm7, %v1265_v35, %v3307_v31  ;;  %v1268_v47 = vsel %vm676_vm7, %v1266_v24, %v3308_v30 }
 0x88b   :  { %v3311_v34 = vpop.permute.xlu1 %3310 }
 0x88c   :  { %v3313_v39 = vunpack.i.h.bf16 %v3311_v34  ;;  %v3312_v41 = vunpack.i.l.bf16 %v3311_v34 }
 0x88e   :  { %v1269_v63 = vsel %vm678_vm8, %v1267_v46, %v3312_v41  ;;  %v1270_v45 = vsel %vm678_vm8, %v1268_v47, %v3313_v39 }
 0x88f   :  { %v1271_v32 = vpack.c.bf16 %v1270_v45, %v1269_v63 }
 0x891   :  { %3114 = vmatmul.mubr.msk.bf16.vlgmr.msra.gmra.mrb[36].mxu1 %vm49_vm0, %v1271_v32 }
 0x892   :  { %3126 = vmatpush3.bf16.msra.mxu1 %v3451_v48  ;;  %3129 = vmatprep.mubr.msk.bf16.mxu1 %vm3481_vm2, %v3480_v22 }
 0x893   :  { %3127 = vmatprep.subr.bf16.mxu1 %v3480_v22 }
 0x896   :  { %3128 = vmatpush3.bf16.msra.mxu1 %v3452_v37 }
 0x897   :  { %3139 = vmatprep.subr.bf16.mxu1 %v3480_v22 }
 0x899   :  { %3130 = vmatmul.mubr.msk.bf16.vlgmr.msra.gmra.mrb[40].mxu1 %vm49_vm0, %v1424_v57 }
 0x89a   :  { %3141 = vmatprep.mubr.msk.bf16.mxu1 %vm3481_vm2, %v3480_v22 }
 0x8e3   :  { %v1417_v58 = vpop.f32.mrb[40].mxu0 }
 0x8e4   :  { %v3123_v59 = vpop.f32.mrb[41].mxu0  ;;  %v1418_v11 = vadd.f32 %v1417_v58, %v3607_v56 }
 0x8e5   :  { %v1420_v61 = vpop.f32.mrb[42].mxu0 }
 0x8e6   :  { %v3124_v42 = vpop.f32.mrb[43].mxu0  ;;  %v3930_v13 = vpack.c.bf16 %v1418_v11, %v1418_v11 }
 0x964   :  { %v3917_v62 = vpop.f32.mrb[36].mxu1 }
 0x965   :  { %v3115_v0 = vpop.f32.mrb[37].mxu1 }
 0x966   :  { %v3919_v1 = vpop.f32.mrb[38].mxu1 }
 0x967   :  { %v3116_v2 = vpop.f32.mrb[39].mxu1 }
 0x96c   :  { %v1462_v3 = vpop.f32.mrb[40].mxu1 }
 0x96d   :  { %v3131_v55 = vpop.f32.mrb[41].mxu1  ;;  %v1463_v6 = vadd.f32 %v1462_v3, %v3607_v56 }
 0x96e   :  { %v1465_v60 = vpop.f32.mrb[42].mxu1 }
 0x96f   :  { %v1466_v8 = vadd.f32 %v1465_v60, %v3607_v56  ;;  %v3132_v9 = vpop.f32.mrb[43].mxu1 }
 0x971   :  { %v3924_v12 = vpack.c.bf16 %v1466_v8, %v1463_v6 }
 0x973   :  { %1582 = vrot.lane.b32.xlu0 %v3924_v12, %s3483_s30  ;;  %1471 = vrot.lane.b32.xlu1 %v3924_v12, %s3482_s29 }
 0x977   :  { %1692 = vrot.lane.b32.xlu0 %v3924_v12, %s3484_s5  ;;  %1580 = vrot.lane.b32.xlu1 %v3930_v13, %s3486_s7 }
 0x97b   :  { %1802 = vrot.lane.b32.xlu0 %v3924_v12, %s3485_s6  ;;  %1690 = vrot.lane.b32.xlu1 %v3930_v13, %s3487_s8 }
 0x97f   :  { %1800 = vrot.lane.b32.xlu1 %v3930_v13, %s3488_s9 }
 0x9e5   :  { %v1472_v5 = vpop.permute.xlu1 %1471  ;;  %v1583_v10 = vpop.permute.xlu0 %1582 }
 0x9e6   :  { %v1477_v20 = vsel %vm223_vm3, %v1472_v5, 0  ;;  %v1588_v14 = vsel %vm223_vm3, %v1583_v10, 0 }
 0x9e7   :  { %3134 = vmatpush3.bf16.xpose.msra.mxu0 %v1477_v20 }
 0x9e8   :  { %3145 = vmatprep.subr.bf16.mxu0 %v3480_v22 }
 0x9e9   :  { %v1693_v51 = vpop.permute.xlu0 %1692  ;;  %v1581_v15 = vpop.permute.xlu1 %1580 }
 0x9ea   :  { %v1698_v16 = vsel %vm223_vm3, %v1693_v51, 0 }
 0x9ed   :  { %v1803_v18 = vpop.permute.xlu0 %1802  ;;  %v1691_v23 = vpop.permute.xlu1 %1690 }
 0x9ee   :  { %3136 = vmatmul.mubr.msk.bf16.vlgmr.msra.gmra.mrb[44].mxu0 %vm223_vm3, %v3930_v13  ;;  %v1808_v25 = vsel %vm223_vm3, %v1803_v18, 0 }
 0x9ef   :  { %3146 = vmatpush3.bf16.xpose.msra.mxu0 %v1588_v14  ;;  %3147 = vmatprep.mubr.msk.bf16.mxu0 %vm3481_vm2, %v3480_v22 }
 0x9f0   :  { %3157 = vmatprep.subr.bf16.mxu0 %v3480_v22 }
 0x9f1   :  { %v1801_v26 = vpop.permute.xlu1 %1800 }
 0x9f6   :  { %3148 = vmatmul.mubr.msk.bf16.vlgmr.msra.gmra.mrb[48].mxu0 %vm223_vm3, %v1581_v15 }
 0x9f7   :  { %3158 = vmatpush3.bf16.xpose.msra.mxu0 %v1698_v16  ;;  %3159 = vmatprep.mubr.msk.bf16.mxu0 %vm3481_vm2, %v3480_v22 }
 0x9f8   :  { %3169 = vmatprep.subr.bf16.mxu0 %v3480_v22 }
 0x9fe   :  { %3160 = vmatmul.mubr.msk.bf16.vlgmr.msra.gmra.mrb[52].mxu0 %vm223_vm3, %v1691_v23 }
 0x9ff   :  { %3170 = vmatpush3.bf16.xpose.msra.mxu0 %v1808_v25  ;;  %3171 = vmatprep.mubr.msk.bf16.mxu0 %vm3481_vm2, %v3480_v22 }
 0xa00   :  { %3181 = vmatprep.subr.bf16.mxu0 %v3480_v22 }
 0xa06   :  { %3172 = vmatmul.mubr.msk.bf16.vlgmr.msra.gmra.mrb[56].mxu0 %vm223_vm3, %v1801_v26 }
 0xa07   :  { %3182 = vmatpush3.bf16.msra.mxu0 %v3739_v36  ;;  %3185 = vmatprep.mubr.msk.bf16.mxu0 %vm3481_vm2, %v3480_v22 }
 0xa08   :  { %3183 = vmatprep.subr.bf16.mxu0 %v3480_v22 }
 0xa0b   :  { %3184 = vmatpush3.bf16.msra.mxu0 %v3749_v38 }
 0xa0c   :  { %3195 = vmatprep.subr.bf16.mxu0 %v3480_v22 }
 0xac1   :  { %v1513_v27 = vpop.f32.mrb[44].mxu0 }
 0xac2   :  { %v3137_v19 = vpop.f32.mrb[45].mxu0  ;;  %v1519_v28 = vsel %vm270_vm4, %v1513_v27, -inf }
 0xac3   :  { %1520 = vmax.xlane.f32.xlu0 %v1519_v28  ;;  %v1516_v29 = vpop.f32.mrb[46].mxu0 }
 0xac4   :  { %v3138_v30 = vpop.f32.mrb[47].mxu0 }
 0xac9   :  { %v1624_v31 = vpop.f32.mrb[48].mxu0 }
 0xaca   :  { %v3149_v21 = vpop.f32.mrb[49].mxu0  ;;  %v1630_v33 = vsel %vm270_vm4, %v1624_v31, -inf }
 0xacb   :  { %1631 = vmax.xlane.f32.xlu1 %v1630_v33  ;;  %v1627_v34 = vpop.f32.mrb[50].mxu0 }
 0xacc   :  { %v3150_v24 = vpop.f32.mrb[51].mxu0 }
 0xad1   :  { %v1734_v35 = vpop.f32.mrb[52].mxu0 }
 0xad2   :  { %v3161_v39 = vpop.f32.mrb[53].mxu0  ;;  %v1740_v41 = vsel %vm270_vm4, %v1734_v35, -inf }
 0xad3   :  { %1741 = vmax.xlane.f32.xlu0 %v1740_v41  ;;  %v1737_v40 = vpop.f32.mrb[54].mxu0 }
 0xad4   :  { %v3162_v46 = vpop.f32.mrb[55].mxu0 }
 0xad9   :  { %v1844_v47 = vpop.f32.mrb[56].mxu0 }
 0xada   :  { %v3173_v63 = vpop.f32.mrb[57].mxu0  ;;  %v1850_v45 = vsel %vm270_vm4, %v1844_v47, -inf }
 0xadb   :  { %1851 = vmax.xlane.f32.xlu0 %v1850_v45  ;;  %v1847_v49 = vpop.f32.mrb[58].mxu0 }
 0xadc   :  { %v3174_v32 = vpop.f32.mrb[59].mxu0 }
 0xb50   :  { %v1521_v54 = vpop.xlane.xlu0 %1520 }
 0xb51   :  { %v1522_v48 = vsub.f32 %v1513_v27, %v1521_v54 }
 0xb53   :  { %v1523_v37 = vmul.f32 1.442695, %v1522_v48 }
 0xb55   :  { %3403 = vpow2.f32 %v1523_v37 }
 0xb58   :  { %v1632_v57 = vpop.xlane.xlu1 %1631 }
 0xb59   :  { %v1633_v58 = vsub.f32 %v1624_v31, %v1632_v57 }
 0xb5b   :  { %v1634_v59 = vmul.f32 1.442695, %v1633_v58 }
 0xb5d   :  { %3405 = vpow2.f32 %v1634_v59 }
 0xb5f   :  { %v3404_v61 = vpop.eup %3403 }
 0xb60   :  { %v1742_v42 = vpop.xlane.xlu0 %1741  ;;  %v1525_v0 = vsel %vm270_vm4, %v3404_v61, 0.0 }
 0xb61   :  { %v1743_v2 = vsub.f32 %v1734_v35, %v1742_v42  ;;  %1526 = vadd.xlane.f32.xlu0 %v1525_v0 }
 0xb63   :  { %v1744_v3 = vmul.f32 1.442695, %v1743_v2 }
 0xb65   :  { %3407 = vpow2.f32 %v1744_v3 }
 0xb67   :  { %v3406_v55 = vpop.eup %3405 }
 0xb68   :  { %v1636_v60 = vsel %vm270_vm4, %v3406_v55, 0.0  ;;  %v1852_v9 = vpop.xlane.xlu0 %1851 }
 0xb69   :  { %1637 = vadd.xlane.f32.xlu1 %v1636_v60  ;;  %v1853_v11 = vsub.f32 %v1844_v47, %v1852_v9 }
 0xb6b   :  { %v1854_v5 = vmul.f32 1.442695, %v1853_v11 }
 0xb6d   :  { %3409 = vpow2.f32 %v1854_v5 }
 0xb6f   :  { %v3408_v6 = vpop.eup %3407 }
 0xb70   :  { %v1746_v8 = vsel %vm270_vm4, %v3408_v6, 0.0 }
 0xb71   :  { %1747 = vadd.xlane.f32.xlu0 %v1746_v8 }
 0xb77   :  { %v3410_v20 = vpop.eup %3409 }
 0xb78   :  { %v1856_v10 = vsel %vm270_vm4, %v3410_v20, 0.0 }
 0xb7a   :  { %1642 = vrot.lane.b32.xlu1 %v3924_v12, %s3489_s10 }
 0xb7e   :  { %1752 = vrot.lane.b32.xlu1 %v3924_v12, %s3490_s11 }
 0xb87   :  { %1531 = vrot.lane.b32.xlu0 %v3924_v12, %s3479_s24 }
 0xb8b   :  { %1978 = vrot.lane.b32.xlu0 %v3930_v13, %s3482_s29 }
 0xb8f   :  { %2099 = vrot.lane.b32.xlu0 %v3924_v12, %s3486_s7 }
 0xb93   :  { %2222 = vrot.lane.b32.xlu0 %v3924_v12, %s3487_s8 }
 0xb97   :  { %2345 = vrot.lane.b32.xlu0 %v3924_v12, %s3488_s9 }
 0xba2   :  { %1857 = vadd.xlane.f32.xlu1 %v1856_v10 }
 0xbb3   :  { %1862 = vrot.lane.b32.xlu1 %v3924_v12, %s3491_s12 }
 0xbb7   :  { %2101 = vrot.lane.b32.xlu1 %v3930_v13, %s3483_s30 }
 0xbbb   :  { %2224 = vrot.lane.b32.xlu1 %v3930_v13, %s3484_s5 }
 0xbbf   :  { %2347 = vrot.lane.b32.xlu1 %v3930_v13, %s3485_s6 }
 0xbee   :  { %v1527_v14 = vpop.xlane.xlu0 %1526 }
 0xbef   :  { %3411 = vrcp.f32 %v1527_v14 }
 0xbf6   :  { %v1638_v51 = vpop.xlane.xlu1 %1637 }
 0xbf7   :  { %3413 = vrcp.f32 %v1638_v51 }
 0xbf9   :  { %v3412_v15 = vpop.eup %3411 }
 0xbfa   :  { %v1529_v18 = vmul.f32 %v3412_v15, %v3404_v61  ;;  %v1643_v26 = vpop.permute.xlu1 %1642 }
 0xbfb   :  { %v1648_v28 = vsel %vm288_vm5, %v1643_v26, 0 }
 0xbfc   :  { %v1530_v27 = vpack.c.bf16 %v1529_v18, %v1529_v18 }
 0xbfe   :  { %v1748_v16 = vpop.xlane.xlu0 %1747  ;;  %v1753_v30 = vpop.permute.xlu1 %1752 }
 0xbff   :  { %3415 = vrcp.f32 %v1748_v16  ;;  %v1758_v33 = vsel %vm288_vm5, %v1753_v30, 0 }
 0xc01   :  { %v3414_v19 = vpop.eup %3413 }
 0xc02   :  { %v1532_v23 = vpop.permute.xlu0 %1531  ;;  %v1640_v29 = vmul.f32 %v3414_v19, %v3406_v55 }
 0xc03   :  { %v1537_v25 = vsel %vm288_vm5, %v1532_v23, 0 }
 0xc04   :  { %3140 = vmatpush3.bf16.msra.mxu1 %v1537_v25  ;;  %v1641_v31 = vpack.c.bf16 %v1640_v29, %v1640_v29 }
 0xc05   :  { %3151 = vmatprep.subr.bf16.mxu1 %v3480_v22 }
 0xc06   :  { %v1979_v47 = vpop.permute.xlu0 %1978 }
 0xc07   :  { %3142 = vmatmul.mubr.msk.bf16.vlgmr.msra.gmra.mrb[44].mxu1 %vm270_vm4, %v1530_v27  ;;  %v1984_v45 = vsel %vm223_vm3, %v1979_v47, 0 }
 0xc08   :  { %3152 = vmatpush3.bf16.msra.mxu1 %v1648_v28  ;;  %3153 = vmatprep.mubr.msk.bf16.mxu1 %vm3481_vm2, %v3480_v22 }
 0xc09   :  { %3163 = vmatprep.subr.bf16.mxu1 %v3480_v22  ;;  %v3416_v21 = vpop.eup %3415 }
 0xc0a   :  { %v1750_v34 = vmul.f32 %v3416_v21, %v3408_v6  ;;  %v2100_v48 = vpop.permute.xlu0 %2099 }
 0xc0c   :  { %v1751_v24 = vpack.c.bf16 %v1750_v34, %v1750_v34 }
 0xc0f   :  { %3154 = vmatmul.mubr.msk.bf16.vlgmr.msra.gmra.mrb[48].mxu1 %vm270_vm4, %v1641_v31 }
 0xc10   :  { %3164 = vmatpush3.bf16.msra.mxu1 %v1758_v33  ;;  %3165 = vmatprep.mubr.msk.bf16.mxu1 %vm3481_vm2, %v3480_v22 }
 0xc11   :  { %3175 = vmatprep.subr.bf16.mxu1 %v3480_v22 }
 0xc17   :  { %3166 = vmatmul.mubr.msk.bf16.vlgmr.msra.gmra.mrb[52].mxu1 %vm270_vm4, %v1751_v24 }
 0xc18   :  { %3177 = vmatprep.mubr.msk.bf16.mxu1 %vm3481_vm2, %v3480_v22 }
 0xc2f   :  { %v1858_v35 = vpop.xlane.xlu1 %1857 }
 0xc30   :  { %3417 = vrcp.f32 %v1858_v35 }
 0xc33   :  { %v1863_v39 = vpop.permute.xlu1 %1862 }
 0xc34   :  { %v1868_v41 = vsel %vm288_vm5, %v1863_v39, 0 }
 0xc35   :  { %3176 = vmatpush3.bf16.msra.mxu1 %v1868_v41 }
 0xc36   :  { %3189 = vmatprep.subr.bf16.mxu1 %v3480_v22 }
 0xc37   :  { %v2102_v49 = vpop.permute.xlu1 %2101 }
 0xc38   :  { %v2107_v32 = vsel %vm223_vm3, %v2102_v49, 0 }
 0xc3a   :  { %v3418_v40 = vpop.eup %3417 }
 0xc3b   :  { %v1860_v46 = vmul.f32 %v3418_v40, %v3410_v20  ;;  %v2225_v54 = vpop.permute.xlu1 %2224 }
 0xc3c   :  { %v2230_v37 = vsel %vm223_vm3, %v2225_v54, 0 }
 0xc3d   :  { %v1861_v63 = vpack.c.bf16 %v1860_v46, %v1860_v46 }
 0xc3f   :  { %3178 = vmatmul.mubr.msk.bf16.vlgmr.msra.gmra.mrb[56].mxu1 %vm270_vm4, %v1861_v63  ;;  %v2348_v57 = vpop.permute.xlu1 %2347 }
 0xc40   :  { %3190 = vmatpush3.bf16.xpose.msra.mxu1 %v1984_v45  ;;  %3191 = vmatprep.mubr.msk.bf16.mxu1 %vm3481_vm2, %v3480_v22  ;;  %v2353_v58 = vsel %vm223_vm3, %v2348_v57, 0 }
 0xc41   :  { %3201 = vmatprep.subr.bf16.mxu1 %v3480_v22 }
 0xc47   :  { %3192 = vmatmul.mubr.msk.bf16.vlgmr.msra.gmra.mrb[60].mxu1 %vm223_vm3, %v3924_v12  ;;  %v2223_v12 = vpop.permute.xlu0 %2222 }
 0xc48   :  { %3202 = vmatpush3.bf16.xpose.msra.mxu1 %v2107_v32  ;;  %3203 = vmatprep.mubr.msk.bf16.mxu1 %vm3481_vm2, %v3480_v22 }
 0xc49   :  { %3213 = vmatprep.subr.bf16.mxu1 %v3480_v22 }
 0xc4b   :  { %v2346_v59 = vpop.permute.xlu0 %2345 }
 0xc4f   :  { %3204 = vmatmul.mubr.msk.bf16.vlgmr.msra.gmra.mrb[64].mxu1 %vm223_vm3, %v2100_v48 }
 0xc50   :  { %3214 = vmatpush3.bf16.xpose.msra.mxu1 %v2230_v37  ;;  %3215 = vmatprep.mubr.msk.bf16.mxu1 %vm3481_vm2, %v3480_v22 }
 0xc51   :  { %3225 = vmatprep.subr.bf16.mxu1 %v3480_v22 }
 0xc57   :  { %3216 = vmatmul.mubr.msk.bf16.vlgmr.msra.gmra.mrb[68].mxu1 %vm223_vm3, %v2223_v12 }
 0xc58   :  { %3226 = vmatpush3.bf16.xpose.msra.mxu1 %v2353_v58  ;;  %3227 = vmatprep.mubr.msk.bf16.mxu1 %vm3481_vm2, %v3480_v22 }
 0xc59   :  { %3237 = vmatprep.subr.bf16.mxu1 %v3480_v22 }
 0xc5f   :  { %3228 = vmatmul.mubr.msk.bf16.vlgmr.msra.gmra.mrb[72].mxu1 %vm223_vm3, %v2346_v59 }
 0xc60   :  { %3238 = vmatpush3.bf16.msra.mxu1 %v3739_v36  ;;  %3241 = vmatprep.mubr.msk.bf16.mxu1 %vm3481_vm2, %v3480_v22 }
 0xc61   :  { %3239 = vmatprep.subr.bf16.mxu1 %v3480_v22 }
 0xc64   :  { %3240 = vmatpush3.bf16.msra.mxu1 %v3749_v38 }
 0xc65   :  { %3253 = vmatprep.subr.bf16.mxu1 %v3480_v22 }
 0xcda   :  { %v4042_v61 = vpop.f32.mrb[44].mxu1 }
 0xcdb   :  { %v3143_v42 = vpop.f32.mrb[45].mxu1 }
 0xcdc   :  { %v1576_v0 = vpop.f32.mrb[46].mxu1 }
 0xcdd   :  { %v3144_v2 = vpop.f32.mrb[47].mxu1 }
 0xce2   :  { %v1684_v3 = vpop.f32.mrb[48].mxu1 }
 0xce3   :  { %v3155_v55 = vpop.f32.mrb[49].mxu1 }
 0xce4   :  { %v1687_v60 = vpop.f32.mrb[50].mxu1 }
 0xce5   :  { %v3156_v6 = vpop.f32.mrb[51].mxu1 }
 0xcea   :  { %v1794_v8 = vpop.f32.mrb[52].mxu1 }
 0xceb   :  { %v3167_v36 = vpop.f32.mrb[53].mxu1 }
 0xcec   :  { %v1797_v9 = vpop.f32.mrb[54].mxu1 }
 0xced   :  { %v3168_v11 = vpop.f32.mrb[55].mxu1 }
 0xd12   :  { %v1904_v5 = vpop.f32.mrb[56].mxu1 }
 0xd13   :  { %v3179_v20 = vpop.f32.mrb[57].mxu1 }
 0xd14   :  { %v1907_v10 = vpop.f32.mrb[58].mxu1 }
 0xd15   :  { %v3180_v14 = vpop.f32.mrb[59].mxu1 }
 0xd1a   :  { %v2020_v38 = vpop.f32.mrb[60].mxu1 }
 0xd1b   :  { %v3193_v51 = vpop.f32.mrb[61].mxu1  ;;  %v2027_v15 = vsel %vm223_vm3, %v2020_v38, -inf }
 0xd1c   :  { %2028 = vmax.xlane.f32.xlu1 %v2027_v15  ;;  %v2023_v16 = vpop.f32.mrb[62].mxu1 }
 0xd1d   :  { %v3194_v18 = vpop.f32.mrb[63].mxu1  ;;  %v2030_v23 = vsel %vm801_vm6, %v2023_v16, -inf }
 0xd1e   :  { %2031 = vmax.xlane.f32.xlu0 %v2030_v23 }
 0xd22   :  { %v2143_v25 = vpop.f32.mrb[64].mxu1 }
 0xd23   :  { %v3205_v26 = vpop.f32.mrb[65].mxu1  ;;  %v2150_v27 = vsel %vm223_vm3, %v2143_v25, -inf }
 0xd24   :  { %2151 = vmax.xlane.f32.xlu0 %v2150_v27  ;;  %v2146_v19 = vpop.f32.mrb[66].mxu1 }
 0xd25   :  { %v3206_v28 = vpop.f32.mrb[67].mxu1  ;;  %v2153_v29 = vsel %vm801_vm6, %v2146_v19, -inf }
 0xd28   :  { %2154 = vmax.xlane.f32.xlu0 %v2153_v29 }
 0xd2a   :  { %v2266_v30 = vpop.f32.mrb[68].mxu1 }
 0xd2b   :  { %v3217_v31 = vpop.f32.mrb[69].mxu1  ;;  %v2273_v21 = vsel %vm223_vm3, %v2266_v30, -inf }
 0xd2c   :  { %2274 = vmax.xlane.f32.xlu1 %v2273_v21  ;;  %v2269_v33 = vpop.f32.mrb[70].mxu1 }
 0xd2d   :  { %v3218_v34 = vpop.f32.mrb[71].mxu1  ;;  %v2276_v24 = vsel %vm801_vm6, %v2269_v33, -inf }
 0xd2e   :  { %2277 = vmax.xlane.f32.xlu0 %v2276_v24 }
 0xd32   :  { %v2389_v35 = vpop.f32.mrb[72].mxu1 }
 0xd33   :  { %v3229_v39 = vpop.f32.mrb[73].mxu1  ;;  %v2396_v41 = vsel %vm223_vm3, %v2389_v35, -inf }
 0xd34   :  { %2397 = vmax.xlane.f32.xlu1 %v2396_v41  ;;  %v2392_v40 = vpop.f32.mrb[74].mxu1 }
 0xd35   :  { %v3230_v46 = vpop.f32.mrb[75].mxu1  ;;  %v2399_v47 = vsel %vm801_vm6, %v2392_v40, -inf }
 0xd36   :  { %2400 = vmax.xlane.f32.xlu0 %v2399_v47 }
 0xd45   :  { %1911 = vrot.lane.b32.xlu1 %v1684_v3, %s3492_s13 }
 0xd49   :  { %1919 = vrot.lane.b32.xlu1 %v1904_v5, %s3493_s16 }
 0xd4c   :  { %1915 = vrot.lane.b32.xlu0 %v1794_v8, %s3494_s19 }
 0xd4d   :  { %2050 = vrot.lane.b32.xlu1 %v3930_v13, %s3479_s24 }
 0xda9   :  { %v2029_v63 = vpop.xlane.xlu1 %2028 }
 0xdaa   :  { %v2033_v45 = vsub.f32 %v2020_v38, %v2029_v63 }
 0xdab   :  { %v2032_v49 = vpop.xlane.xlu0 %2031 }
 0xdac   :  { %v2035_v32 = vmul.f32 1.442695, %v2033_v45  ;;  %v2034_v54 = vsub.f32 %v2023_v16, %v2032_v49 }
 0xdae   :  { %3419 = vpow2.f32 %v2035_v32  ;;  %v2037_v48 = vmul.f32 1.442695, %v2034_v54 }
 0xdb0   :  { %3421 = vpow2.f32 %v2037_v48 }
 0xdb1   :  { %v2152_v37 = vpop.xlane.xlu0 %2151 }
 0xdb2   :  { %v2156_v57 = vsub.f32 %v2143_v25, %v2152_v37 }
 0xdb4   :  { %v2158_v12 = vmul.f32 1.442695, %v2156_v57 }
 0xdb5   :  { %v2155_v58 = vpop.xlane.xlu0 %2154 }
 0xdb6   :  { %3423 = vpow2.f32 %v2158_v12  ;;  %v2157_v59 = vsub.f32 %v2146_v19, %v2155_v58 }
 0xdb8   :  { %v4057_v42 = vpop.eup %3419  ;;  %v2160_v0 = vmul.f32 1.442695, %v2157_v59 }
 0xdb9   :  { %v2275_v2 = vpop.xlane.xlu1 %2274  ;;  %v2039_v3 = vsel %vm223_vm3, %v4057_v42, 0.0 }
 0xdba   :  { %v3422_v55 = vpop.eup %3421  ;;  %3425 = vpow2.f32 %v2160_v0  ;;  %v2279_v60 = vsub.f32 %v2266_v30, %v2275_v2  ;;  %2040 = vadd.xlane.f32.xlu1 %v2039_v3 }
 0xdbb   :  { %v2278_v6 = vpop.xlane.xlu0 %2277  ;;  %v2042_v8 = vsel %vm801_vm6, %v3422_v55, 0.0 }
 0xdbc   :  { %v2281_v36 = vmul.f32 1.442695, %v2279_v60  ;;  %v2280_v9 = vsub.f32 %v2269_v33, %v2278_v6  ;;  %2043 = vadd.xlane.f32.xlu0 %v2042_v8 }
 0xdbe   :  { %3427 = vpow2.f32 %v2281_v36  ;;  %v2283_v11 = vmul.f32 1.442695, %v2280_v9 }
 0xdc0   :  { %v4062_v5 = vpop.eup %3423  ;;  %3429 = vpow2.f32 %v2283_v11 }
 0xdc1   :  { %v2398_v20 = vpop.xlane.xlu1 %2397  ;;  %v2162_v10 = vsel %vm223_vm3, %v4062_v5, 0.0 }
 0xdc2   :  { %v2402_v14 = vsub.f32 %v2389_v35, %v2398_v20  ;;  %2163 = vadd.xlane.f32.xlu1 %v2162_v10 }
 0xdc3   :  { %v2401_v38 = vpop.xlane.xlu0 %2400 }
 0xdc4   :  { %v3426_v51 = vpop.eup %3425  ;;  %v2404_v15 = vmul.f32 1.442695, %v2402_v14  ;;  %v2403_v16 = vsub.f32 %v2392_v40, %v2401_v38 }
 0xdc5   :  { %v1912_v18 = vpop.permute.xlu1 %1911  ;;  %v2165_v23 = vsel %vm801_vm6, %v3426_v51, 0.0 }
 0xdc6   :  { %3431 = vpow2.f32 %v2404_v15  ;;  %v2406_v25 = vmul.f32 1.442695, %v2403_v16  ;;  %v1922_v26 = vsel %vm223_vm3, %v4042_v61, %v1912_v18  ;;  %2166 = vadd.xlane.f32.xlu0 %v2165_v23 }
 0xdc7   :  { %v1916_v27 = vpop.permute.xlu0 %1915 }
 0xdc8   :  { %v4069_v19 = vpop.eup %3427  ;;  %3433 = vpow2.f32 %v2406_v25  ;;  %v1923_v28 = vsel %vm676_vm7, %v1922_v26, %v1916_v27 }
 0xdc9   :  { %v1920_v29 = vpop.permute.xlu1 %1919  ;;  %v2285_v30 = vsel %vm223_vm3, %v4069_v19, 0.0 }
 0xdca   :  { %v3430_v31 = vpop.eup %3429  ;;  %v1924_v21 = vsel %vm678_vm8, %v1923_v28, %v1920_v29  ;;  %2286 = vadd.xlane.f32.xlu0 %v2285_v30 }
 0xdcb   :  { %v1925_v33 = vpack.c.bf16 %v1924_v21, %v1924_v21  ;;  %v2288_v61 = vsel %vm801_vm6, %v3430_v31, 0.0 }
 0xdcd   :  { %v2051_v34 = vpop.permute.xlu1 %2050  ;;  %3186 = vmatmul.mubr.msk.bf16.vlgmr.msra.gmra.mrb[60].mxu0 %vm49_vm0, %v1925_v33 }
 0xdce   :  { %v2056_v24 = vsel %vm827_vm9, %v2051_v34, 0  ;;  %2289 = vadd.xlane.f32.xlu0 %v2288_v61  ;;  %3197 = vmatprep.mubr.msk.bf16.mxu0 %vm3481_vm2, %v3480_v22 }
 0xdcf   :  { %3196 = vmatpush3.bf16.msra.mxu0 %v2056_v24 }
 0xdd0   :  { %v3432_v35 = vpop.eup %3431  ;;  %3207 = vmatprep.subr.bf16.mxu0 %v3480_v22 }
 0xdd1   :  { %v2408_v39 = vsel %vm223_vm3, %v3432_v35, 0.0 }
 0xdd2   :  { %v3434_v41 = vpop.eup %3433  ;;  %2409 = vadd.xlane.f32.xlu1 %v2408_v39 }
 0xdd3   :  { %v2411_v40 = vsel %vm801_vm6, %v3434_v41, 0.0 }
 0xdd4   :  { %2412 = vadd.xlane.f32.xlu0 %v2411_v40 }
 0xde3   :  { %2296 = vrot.lane.b32.xlu1 %v3930_v13, %s3490_s11 }
 0xde7   :  { %2419 = vrot.lane.b32.xlu1 %v3930_v13, %s3491_s12 }
 0xdea   :  { %2173 = vrot.lane.b32.xlu0 %v3930_v13, %s3489_s10 }
 0xe47   :  { %v2041_v46 = vpop.xlane.xlu1 %2040 }
 0xe48   :  { %3435 = vrcp.f32 %v2041_v46 }
 0xe49   :  { %v2044_v47 = vpop.xlane.xlu0 %2043 }
 0xe4a   :  { %3437 = vrcp.f32 %v2044_v47 }
 0xe4f   :  { %v2164_v48 = vpop.xlane.xlu1 %2163 }
 0xe52   :  { %v3436_v63 = vpop.eup %3435 }
 0xe53   :  { %v2167_v45 = vpop.xlane.xlu0 %2166  ;;  %v2047_v32 = vmul.f32 %v3436_v63, %v4057_v42 }
 0xe54   :  { %v3438_v49 = vpop.eup %3437  ;;  %3439 = vrcp.f32 %v2167_v45 }
 0xe55   :  { %v2048_v54 = vmul.f32 %v3438_v49, %v3422_v55  ;;  %3441 = vrcp.f32 %v2164_v48 }
 0xe57   :  { %v2287_v37 = vpop.xlane.xlu0 %2286  ;;  %v2049_v57 = vpack.c.bf16 %v2048_v54, %v2047_v32 }
 0xe59   :  { %3198 = vmatmul.mubr.msk.bf16.vlgmr.msra.gmra.mrb[64].mxu0 %vm223_vm3, %v2049_v57 }
 0xe5a   :  { %3209 = vmatprep.mubr.msk.bf16.mxu0 %vm3481_vm2, %v3480_v22 }
 0xe5b   :  { %v2290_v13 = vpop.xlane.xlu0 %2289 }
 0xe5c   :  { %3443 = vrcp.f32 %v2290_v13 }
 0xe5d   :  { %3445 = vrcp.f32 %v2287_v37 }
 0xe5e   :  { %v3440_v12 = vpop.eup %3439 }
 0xe5f   :  { %v2410_v58 = vpop.xlane.xlu1 %2409  ;;  %v3442_v0 = vpop.eup %3441  ;;  %v2171_v2 = vmul.f32 %v3440_v12, %v3426_v51 }
 0xe60   :  { %v2170_v3 = vmul.f32 %v3442_v0, %v4062_v5 }
 0xe61   :  { %v2413_v59 = vpop.xlane.xlu0 %2412 }
 0xe62   :  { %3447 = vrcp.f32 %v2413_v59  ;;  %v2172_v6 = vpack.c.bf16 %v2171_v2, %v2170_v3 }
 0xe63   :  { %v2297_v60 = vpop.permute.xlu1 %2296  ;;  %3449 = vrcp.f32 %v2410_v58 }
 0xe64   :  { %v2302_v36 = vsel %vm827_vm9, %v2297_v60, 0 }
 0xe65   :  { %v2174_v42 = vpop.permute.xlu0 %2173 }
 0xe66   :  { %v2179_v55 = vsel %vm827_vm9, %v2174_v42, 0  ;;  %v3444_v8 = vpop.eup %3443 }
 0xe67   :  { %3208 = vmatpush3.bf16.msra.mxu0 %v2179_v55  ;;  %v3446_v9 = vpop.eup %3445  ;;  %v2294_v11 = vmul.f32 %v3444_v8, %v3430_v31  ;;  %v2420_v20 = vpop.permute.xlu1 %2419 }
 0xe68   :  { %3219 = vmatprep.subr.bf16.mxu0 %v3480_v22  ;;  %v2293_v5 = vmul.f32 %v3446_v9, %v4069_v19  ;;  %v2425_v38 = vsel %vm827_vm9, %v2420_v20, 0 }
 0xe6a   :  { %3210 = vmatmul.mubr.msk.bf16.vlgmr.msra.gmra.mrb[68].mxu0 %vm223_vm3, %v2172_v6  ;;  %v2295_v10 = vpack.c.bf16 %v2294_v11, %v2293_v5 }
 0xe6b   :  { %3220 = vmatpush3.bf16.msra.mxu0 %v2302_v36  ;;  %3221 = vmatprep.mubr.msk.bf16.mxu0 %vm3481_vm2, %v3480_v22 }
 0xe6c   :  { %3231 = vmatprep.subr.bf16.mxu0 %v3480_v22  ;;  %v3448_v14 = vpop.eup %3447 }
 0xe6d   :  { %v3450_v51 = vpop.eup %3449  ;;  %v2417_v15 = vmul.f32 %v3448_v14, %v3434_v41 }
 0xe6e   :  { %v2416_v16 = vmul.f32 %v3450_v51, %v3432_v35 }
 0xe70   :  { %v2418_v18 = vpack.c.bf16 %v2417_v15, %v2416_v16  ;;  %v3333_v16 = vld [vmem:[%s4215_s3 + $0x20] sm:$0xff]  }
 0xe72   :  { %3222 = vmatmul.mubr.msk.bf16.vlgmr.msra.gmra.mrb[72].mxu0 %vm223_vm3, %v2295_v10 }
 0xe73   :  { %3232 = vmatpush3.bf16.msra.mxu0 %v2425_v38  ;;  %3233 = vmatprep.mubr.msk.bf16.mxu0 %vm3481_vm2, %v3480_v22 }
 0xe74   :  { %3245 = vmatprep.subr.bf16.mxu0 %v3480_v22 }
 0xe7a   :  { %3234 = vmatmul.mubr.msk.bf16.vlgmr.msra.gmra.mrb[76].mxu0 %vm223_vm3, %v2418_v18 }
 0xe7b   :  { %3249 = vmatprep.mubr.msk.bf16.mxu0 %vm3481_vm2, %v3480_v22 }
 0xea0   :  { %v1963_v23 = vpop.f32.mrb[60].mxu0 }
 0xea1   :  { %v3187_v25 = vpop.f32.mrb[61].mxu0 }
 0xea2   :  { %v1966_v26 = vpop.f32.mrb[62].mxu0 }
 0xea3   :  { %v3188_v27 = vpop.f32.mrb[63].mxu0 }
 0xf2c   :  { %v2092_v19 = vpop.f32.mrb[64].mxu0 }
 0xf2d   :  { %v3199_v28 = vpop.f32.mrb[65].mxu0 }
 0xf2e   :  { %v2095_v29 = vpop.f32.mrb[66].mxu0 }
 0xf2f   :  { %v3200_v30 = vpop.f32.mrb[67].mxu0 }
 0xf3d   :  { %v2215_v31 = vpop.f32.mrb[68].mxu0 }
 0xf3e   :  { %v3211_v21 = vpop.f32.mrb[69].mxu0 }
 0xf3f   :  { %v2218_v33 = vpop.f32.mrb[70].mxu0 }
 0xf40   :  { %v3314_v34 = vpack.i.bf16 %v2218_v33, %v2215_v31  ;;  %v3212_v61 = vpop.f32.mrb[71].mxu0 }
 0xf42   :  { %3315 = vrot.lane.b32.xlu1 %v3314_v34, %s3492_s13 }
 0xf45   :  { %v2338_v24 = vpop.f32.mrb[72].mxu0 }
 0xf46   :  { %v3223_v35 = vpop.f32.mrb[73].mxu0 }
 0xf47   :  { %v2341_v39 = vpop.f32.mrb[74].mxu0  ;;  %v3336_v35 = vld [vmem:[%s4215_s3 + $0x38] sm:$0xff]  }
 0xf48   :  { %v3319_v41 = vpack.i.bf16 %v2341_v39, %v2338_v24  ;;  %v3224_v40 = vpop.f32.mrb[75].mxu0  ;;  %v3335_v24 = vld [vmem:[%s4215_s3 + $0x30] sm:$0xff]  }
 0xf49   :  { %3246 = vmatpush3.bf16.msra.mxu0 %v3335_v24 }
 0xf4a   :  { %3320 = vrot.lane.b32.xlu1 %v3319_v41, %s3494_s19  ;;  %3247 = vmatprep.subr.bf16.mxu0 %v3480_v22 }
 0xf4d   :  { %v2461_v46 = vpop.f32.mrb[76].mxu0  ;;  %3248 = vmatpush3.bf16.msra.mxu0 %v3336_v35 }
 0xf4e   :  { %694 = vrot.lane.b32.xlu1 %v3607_v56, %s3478_s23  ;;  %v3235_v47 = vpop.f32.mrb[77].mxu0  ;;  %3261 = vmatprep.subr.bf16.mxu0 %v3480_v22 }
 0xf4f   :  { %v2464_v63 = vpop.f32.mrb[78].mxu0 }
 0xf50   :  { %v3324_v45 = vpack.i.bf16 %v2464_v63, %v2461_v46  ;;  %v3236_v49 = vpop.f32.mrb[79].mxu0 }
 0xf52   :  { %3325 = vrot.lane.b32.xlu0 %v3324_v45, %s3493_s16 }
 0xfb4   :  { %v3316_v32 = vpop.permute.xlu1 %3315 }
 0xfb5   :  { %v3318_v48 = vunpack.i.h.bf16 %v3316_v32  ;;  %v3317_v37 = vunpack.i.l.bf16 %v3316_v32 }
 0xfb7   :  { %v2492_v60 = vsel %vm223_vm3, %v2092_v19, %v3317_v37  ;;  %v3334_v19 = vld [vmem:[%s4215_s3 + $0x28] sm:$0xff]  }
 0xfbc   :  { %v3321_v54 = vpop.permute.xlu1 %3320 }
 0xfbd   :  { %v3323_v59 = vunpack.i.h.bf16 %v3321_v54  ;;  %v3322_v0 = vunpack.i.l.bf16 %v3321_v54 }
 0xfbf   :  { %v2494_v11 = vsel %vm676_vm7, %v2492_v60, %v3322_v0 }
 0xfc0   :  { %v4115_v57 = vpop.permute.xlu1 %694 }
 0xfc1   :  { %v735_v13 = vadd.f32 %v3870_v4, %v4115_v57  ;;  %v1310_v12 = vadd.f32 %v3917_v62, %v4115_v57  ;;  %v1313_v56 = vadd.f32 %v3919_v1, %v4115_v57  ;;  %v1964_v58 = vadd.f32 %v1963_v23, %v4115_v57 }
 0xfc2   :  { %v2493_v4 = vsel %vm223_vm3, %v2095_v29, %v3318_v48 }
 0xfc3   :  { %v740_v2 = vadd.f32 %v735_v13, %v3598_v53  ;;  %v1316_v42 = vadd.f32 %v1310_v12, %v3584_v43  ;;  %v1317_v3 = vadd.f32 %v1313_v56, %v3587_v44  ;;  %v1969_v55 = vadd.f32 %v1964_v58, %v3876_v7 }
 0xfc4   :  { %v3326_v62 = vpop.permute.xlu0 %3325  ;;  %v2495_v9 = vsel %vm676_vm7, %v2493_v4, %v3323_v59 }
 0xfc5   :  { %v741_v6 = vmul.f32 0.5, %v740_v2  ;;  %v1318_v8 = vmul.f32 0.5, %v1316_v42  ;;  %v1319_v1 = vmul.f32 0.5, %v1317_v3  ;;  %v1970_v36 = vmul.f32 0.5, %v1969_v55 }
 0xfc6   :  { %v3328_v53 = vunpack.i.h.bf16 %v3326_v62  ;;  %v3327_v5 = vunpack.i.l.bf16 %v3326_v62 }
 0xfc7   :  { %v742_v43 = vsel %vm49_vm0, %v741_v6, -inf  ;;  %v1320_v44 = vsel %vm49_vm0, %v1318_v8, -inf  ;;  %v1321_v7 = vsel %vm79_vm1, %v1319_v1, -inf  ;;  %v1971_v20 = vsel %vm49_vm0, %v1970_v36, -inf  ;;  %v3337_v1 = vld [vmem:[%s4215_s3 + $0x40] sm:$0xff]  }
 0xfc8   :  { %v743_v10 = vrot.slane %v742_v43, 4  ;;  %v1322_v14 = vmax.f32 %v1320_v44, %v1321_v7  ;;  %v1972_v38 = vrot.slane %v1971_v20, 4  ;;  %v2497_v51 = vsel %vm678_vm8, %v2495_v9, %v3328_v53  ;;  %v3338_v9 = vld [vmem:[%s4215_s3 + $0x48] sm:$0xff]   ;;  %v3339_v53 = vld [vmem:[%s4215_s3 + $0x50] sm:$0xff]   ;;  %v3340_v44 = vld [vmem:[%s4215_s3 + $0x58] sm:$0xff]  }
 0xfc9   :  { %v2496_v15 = vsel %vm678_vm8, %v2494_v11, %v3327_v5  ;;  %v2673_v11 = vsub.s32 2, %v3535_v17  ;;  %v3453_v5 = vld [vmem:[%s4214_s2] sm:$0x7] }
 0xfca   :  { %v744_v18 = vmax.f32 %v742_v43, %v743_v10  ;;  %v1973_v23 = vmax.f32 %v1971_v20, %v1972_v38  ;;  %v2498_v25 = vpack.c.bf16 %v2497_v51, %v2496_v15  ;;  %v1323_v46 = vrot.slane %v1322_v14, 4 }
 0xfcb   :  { %v2674_v43 = vrot.slane %v3453_v5, %v2673_v11 }
 0xfcc   :  { %v745_v26 = vrot.slane %v744_v18, 2  ;;  %v1974_v27 = vrot.slane %v1973_v23, 2  ;;  %3242 = vmatmul.mubr.msk.bf16.vlgmr.msra.gmra.mrb[76].mxu1 %vm49_vm0, %v2498_v25  ;;  %v1324_v48 = vmax.f32 %v1322_v14, %v1323_v46 }
 0xfcd   :  { %3254 = vmatpush3.bf16.msra.mxu1 %v3333_v16  ;;  %3257 = vmatprep.mubr.msk.bf16.mxu1 %vm3481_vm2, %v3480_v22  ;;  %v3341_v16 = vld [vmem:[%s4215_s3 + $0x60] sm:$0xff]  }
 0xfce   :  { %3255 = vmatprep.subr.bf16.mxu1 %v3480_v22  ;;  %v746_v28 = vmax.f32 %v744_v18, %v745_v26  ;;  %v1975_v29 = vmax.f32 %v1973_v23, %v1974_v27  ;;  %v1325_v58 = vrot.slane %v1324_v48, 2  ;;  %2703 = vrot.lane.b32.xlu0 %v2674_v43, %s3479_s24  ;;  %v3342_v18 = vld [vmem:[%s4215_s3 + $0x68] sm:$0xff]   ;;  %s3454_s3 = scalar_lea.vmem %s2819_s26, 32 }
 0xfcf   :  { %2764 = vrot.lane.b32.xlu1 %v2674_v43, %s3478_s23  ;;  %p3455_p0 = scmp.ne.s32.totalorder %s2819_s26, %s3454_s3  ;;  %p3460_p2 = scmp.lt.s32.totalorder %s3454_s3, %s3454_s3 }
 0xfd0   :  { %v747_v30 = vrot.slane %v746_v28, 1  ;;  %v1976_v31 = vrot.slane %v1975_v29, 1  ;;  %v1326_v55 = vmax.f32 %v1324_v48, %v1325_v58 }
 0xfd1   :  { %3256 = vmatpush3.bf16.msra.mxu1 %v3334_v19  ;;  %p3461_p3 = por %p3460_p2, %p3459_p1 }
 0xfd2   :  { %v748_v21 = vmax.f32 %v746_v28, %v747_v30  ;;  %v1977_v33 = vmax.f32 %v1975_v29, %v1976_v31  ;;  %3273 = vmatprep.subr.bf16.mxu1 %v3480_v22  ;;  %v1327_v60 = vrot.slane %v1326_v55, 1 }
 0xfd3   :  { %p3462_p4 = pnand %p3461_p3, %p3455_p0 }
 0xfd4   :  { %v2557_v34 = vsel %vm2556_vm10, %v748_v21, %v1977_v33  ;;  %v1328_v6 = vmax.f32 %v1326_v55, %v1327_v60 }
 0xfd5   :  { %v2558_v61 = vpack.c.bf16 %v2557_v34, %v2557_v34 }
 0xfd7   :  { %3258 = vmatmul.mubr.msk.bf16.vlgmr.msra.gmra.mrb[80].mxu1 %vm49_vm0, %v2558_v61 }
 0xfd8   :  { %3277 = vmatprep.mubr.msk.bf16.mxu1 %vm3481_vm2, %v3480_v22  ;;  %3274 = vmatpush3.bf16.msra.mxu1 %v3341_v16 }
 0xfd9   :  { %3275 = vmatprep.subr.bf16.mxu1 %v3480_v22 }
 0xfdc   :  { %3276 = vmatpush3.bf16.msra.mxu1 %v3342_v18 }
0x1040   :  { %v2704_v23 = vpop.permute.xlu0 %2703 }
0x1041   :  { %v2765_v31 = vpop.permute.xlu1 %2764 }
0x109f   :  { %v2536_v39 = vpop.f32.mrb[76].mxu1 }
0x10a0   :  { %v2537_v41 = vadd.f32 %v2536_v39, %v4115_v57  ;;  %v3243_v40 = vpop.f32.mrb[77].mxu1 }
0x10a1   :  { %v2539_v47 = vpop.f32.mrb[78].mxu1 }
0x10a2   :  { %v2543_v63 = vadd.f32 %v2537_v41, %v3903_v50  ;;  %v2540_v45 = vadd.f32 %v2539_v47, %v4115_v57  ;;  %v3244_v49 = vpop.f32.mrb[79].mxu1 }
0x10a4   :  { %v2545_v32 = vmul.f32 0.5, %v2543_v63  ;;  %v2544_v54 = vadd.f32 %v2540_v45, %v3906_v52 }
0x10a6   :  { %v2546_v37 = vmul.f32 0.5, %v2544_v54  ;;  %v2547_v13 = vsel %vm49_vm0, %v2545_v32, -inf }
0x10a8   :  { %v2548_v12 = vsel %vm79_vm1, %v2546_v37, -inf }
0x10a9   :  { %v2549_v56 = vmax.f32 %v2547_v13, %v2548_v12 }
0x10aa   :  { %v2665_v59 = vpop.f32.mrb[80].mxu1 }
0x10ab   :  { %v2550_v0 = vrot.slane %v2549_v56, 4  ;;  %v3259_v2 = vpop.f32.mrb[81].mxu1 }
0x10ac   :  { %v2668_v42 = vpop.f32.mrb[82].mxu1 }
0x10ad   :  { %v2551_v3 = vmax.f32 %v2549_v56, %v2550_v0  ;;  %v3260_v50 = vpop.f32.mrb[83].mxu1 }
0x10af   :  { %v2552_v57 = vrot.slane %v2551_v3, 2 }
0x10b1   :  { %v2553_v4 = vmax.f32 %v2551_v3, %v2552_v57 }
0x10b3   :  { %v2554_v62 = vrot.slane %v2553_v4, 1 }
0x10b5   :  { %v2555_v52 = vmax.f32 %v2553_v4, %v2554_v62 }
0x10b7   :  { %v2559_v8 = vsel %vm2556_vm10, %v1328_v6, %v2555_v52 }
0x10b8   :  { %v2560_v36 = vpack.c.bf16 %v2559_v8, %v2559_v8 }
0x10ba   :  { %3250 = vmatmul.mubr.msk.bf16.vlgmr.msra.gmra.mrb[80].mxu0 %vm49_vm0, %v2560_v36 }
0x10bb   :  { %3262 = vmatpush3.bf16.msra.mxu0 %v3337_v1  ;;  %3269 = vmatprep.mubr.msk.bf16.mxu0 %vm3481_vm2, %v3480_v22 }
0x10bc   :  { %3263 = vmatprep.subr.bf16.mxu0 %v3480_v22 }
0x10bf   :  { %3264 = vmatpush3.bf16.msra.mxu0 %v3338_v9 }
0x10c0   :  { %3265 = vmatprep.subr.bf16.mxu0 %v3480_v22 }
0x10c3   :  { %3266 = vmatpush3.bf16.msra.mxu0 %v3339_v53 }
0x10c4   :  { %3267 = vmatprep.subr.bf16.mxu0 %v3480_v22 }
0x10c7   :  { %3268 = vmatpush3.bf16.msra.mxu0 %v3340_v44 }
0x118d   :  { %v2610_v17 = vpop.f32.mrb[80].mxu0 }
0x118e   :  { %v2666_v7 = vadd.f32 %v2665_v59, %v2610_v17  ;;  %v3251_v20 = vpop.f32.mrb[81].mxu0 }
0x118f   :  { %v2613_v10 = vpop.f32.mrb[82].mxu0 }
0x1190   :  { %v2675_v14 = vadd.f32 %v2674_v43, %v2666_v7  ;;  %v3252_v38 = vpop.f32.mrb[83].mxu0 }
0x1192   :  { %v2676_v51 = vmax.f32 %v2675_v14, 0.0 }
0x1194   :  { %v2677_v15 = vpack.c.bf16 %v2676_v51, %v2676_v51 }
0x1196   :  { %3270 = vmatmul.mubr.msk.bf16.vlgmr.msra.gmra.mrb[84].mxu0 %vm2706_vm11, %v2677_v15 }
0x1269   :  { %v2744_v25 = vpop.f32.mrb[84].mxu0 }
0x126a   :  { %v2745_v26 = vadd.f32 %v2744_v25, %v2704_v23  ;;  %v3271_v27 = vpop.f32.mrb[85].mxu0 }
0x126b   :  { %v2747_v19 = vpop.f32.mrb[86].mxu0 }
0x126c   :  { %v2750_v28 = vmax.f32 %v2745_v26, 0.0  ;;  %v3272_v29 = vpop.f32.mrb[87].mxu0 }
0x126e   :  { %v2751_v30 = vpack.c.bf16 %v2750_v28, %v2750_v28 }
0x1270   :  { %3278 = vmatmul.mubr.msk.bf16.vlgmr.msra.gmra.mrb[84].mxu1 %vm49_vm0, %v2751_v30 }
0x1343   :  { %v2804_v21 = vpop.f32.mrb[84].mxu1 }
0x1344   :  { %v2805_v22 = vadd.f32 %v2804_v21, %v2765_v31  ;;  %v3279_v33 = vpop.f32.mrb[85].mxu1 }
0x1345   :  { %v2807_v34 = vpop.f32.mrb[86].mxu1 }
0x1346   :  { %v3280_v61 = vpop.f32.mrb[87].mxu1  ;;  %2811 = vst.msk [vmem:[#allocation2] sm:$0x3] %vm2810_vm12, %v2805_v22 }
0x1347   :  { %3465 = shalt.err (!%p3462_p4)
}
0x1348   :  { %s3466_s1 = scalar_lea.hbm %s4216_s4, 32 }
0x1349   :  { %p3467_p5 = scmp.ne.s32.totalorder %s4216_s4, %s3466_s1  ;;  %p3470_p6 = scmp.lt.u32.totalorder %s3466_s1, %s4216_s4 }
0x134b   :  { %p3472_p7 = pnand %p3470_p6, %p3467_p5 }
0x134d   :  { %3475 = shalt.err (!%p3472_p7)
}
0x134e   :  { %2821 = dma.vmem_to_hbm [thread:$0]  %s2819_s26, 32, %s4216_s4, [#allocation3]  }
0x134f   :  { %3476 = dma.done.wait [#allocation3], 32  }
0x1350   :  { %3477 = vsyncadd [#allocation3], 4294967264 }
0x1351   :  { %2825 = vsyncpa [#allocation3], 1 }

</bundles_post_ra>
